<compile_context>
chip_gen: v7x
topology: tpu7x:2x2x1
jax: 0.10.0
libtpu: 0.0.40
codegen_flags: <defaults>
</compile_context>

<pallas_src>
import functools

import jax
import jax.numpy as jnp
from jax import lax
from jax.experimental import pallas as pl
from jax.experimental.pallas import tpu as pltpu

_INV_SQRT2 = 0.7071067811865476


def _ffn_kernel(x_ref, g_ref, b_ref, w1_ref, b1_ref, w2_ref, b2_ref, o_ref,
                xn_ref, acc_ref):
    """Grid = (row_tiles, d_hid_chunks); the d_hid axis is the reduction axis.

    x_ref:   (TM, d_in)   input rows (re-read as residual at finalize)
    g_ref:   (1, d_in)    layernorm gamma (f32)
    b_ref:   (1, d_in)    layernorm beta  (f32)
    w1_ref:  (d_in, TH)   W1 column panel (bf16)
    b1_ref:  (1, TH)      b1 chunk (f32)
    w2_ref:  (TH, d_in)   W2 row panel (bf16)
    b2_ref:  (1, d_in)    b2 (f32)
    o_ref:   (TM, d_in)   output rows
    xn_ref:  (TM, d_in)   VMEM scratch: layer-normed rows (matmul dtype)
    acc_ref: (TM, d_in)   VMEM scratch: f32 accumulator for the second matmul
    """
    k = pl.program_id(1)

    @pl.when(k == 0)
    def _init():
        x = x_ref[...].astype(jnp.float32)
        inv_d = jnp.float32(1.0 / x.shape[-1])
        # Two-pass statistics (mean, then centered variance) for stability.
        mean = jnp.sum(x, axis=-1, keepdims=True) * inv_d
        xc = x - mean
        var = jnp.sum(xc * xc, axis=-1, keepdims=True) * inv_d
        xn = xc * lax.rsqrt(var + jnp.float32(1e-6)) * g_ref[...] + b_ref[...]
        xn_ref[...] = xn.astype(xn_ref.dtype)          # bf16 operand for MXU
        acc_ref[...] = jnp.zeros_like(acc_ref)

    # --- w_1 panel + exact (erf) GELU; bf16 operands, f32 accumulation ---
    h = jnp.dot(xn_ref[...], w1_ref[...], preferred_element_type=jnp.float32)
    h = h + b1_ref[...]
    h = 0.5 * h * (1.0 + lax.erf(h * jnp.float32(_INV_SQRT2)))

    # --- w_2 panel accumulated into the resident f32 accumulator ---
    acc_ref[...] += jnp.dot(h.astype(w2_ref.dtype), w2_ref[...],
                            preferred_element_type=jnp.float32)

    @pl.when(k == pl.num_programs(1) - 1)
    def _finalize():
        y = acc_ref[...] + b2_ref[...] + x_ref[...].astype(jnp.float32)
        o_ref[...] = y.astype(o_ref.dtype)


def _round_up(v, m):
    return ((v + m - 1) // m) * m


def _pick_tile_h(d_hid, cap):
    """Largest d_hid chunk <= cap that divides d_hid exactly.

    Chunks must divide d_hid exactly (a ragged W1/W2 panel would pollute the
    accumulator) and be a multiple of 128 lanes, unless the full d_hid is used.
    """
    if d_hid <= cap:
        return d_hid
    th = (cap // 128) * 128
    while th >= 128:
        if d_hid % th == 0:
            return th
        th -= 128
    return d_hid   # no aligned divisor <= cap: keep the weights fully resident


def _vmem_limit_bytes():
    """~3/4 of per-core VMEM: ~96 MiB on v5e/v6e (128 MiB), ~48 MiB on v7x (64 MiB)."""
    try:
        cap = int(pltpu.get_tpu_info().vmem_capacity_bytes)
    except Exception:
        cap = 64 * 1024 * 1024        # conservative fallback (v7x per-core size)
    return (cap * 3) // 4


@functools.partial(jax.jit, static_argnames=("tile_m", "tile_h"))
def _positionwise_ffn(x, ln_gamma, ln_beta, w1, b1, w2, b2, *, tile_m, tile_h):
    batch, seq, d_in = x.shape
    d_hid = w1.shape[1]
    n = batch * seq

    # Row tiles: MXU-aligned, capped for tiny inputs; the ragged last tile is
    # handled by Pallas (rows are independent; OOB output rows never stored).
    tile_m_eff = _round_up(min(tile_m, _round_up(n, 128)), 8)
    num_row_tiles = pl.cdiv(n, tile_m_eff)

    # d_hid chunks: must divide d_hid exactly.
    tile_h_eff = _pick_tile_h(d_hid, tile_h)
    num_h_chunks = d_hid // tile_h_eff

    mm_dtype = jnp.bfloat16    # native MXU dtype on v5e/v6e/v7x

    x2 = x.reshape(n, d_in)
    g2 = ln_gamma.astype(jnp.float32).reshape(1, d_in)
    be2 = ln_beta.astype(jnp.float32).reshape(1, d_in)
    w1c = w1.astype(mm_dtype)
    w2c = w2.astype(mm_dtype)
    b1r = b1.astype(jnp.float32).reshape(1, d_hid)
    b2r = b2.astype(jnp.float32).reshape(1, d_in)

    def nbytes(a):
        return a.size * a.dtype.itemsize

    rows_padded = num_row_tiles * tile_m_eff
    cost = pl.CostEstimate(
        flops=4 * rows_padded * d_in * d_hid,          # two matmuls, 2 flops/MAC
        transcendentals=rows_padded * d_hid,           # erf inside GELU
        bytes_accessed=(2 * nbytes(x2)                 # x in + out
                        + num_row_tiles * (nbytes(w1c) + nbytes(w2c))
                        + nbytes(b1r) + nbytes(b2r) + nbytes(g2) + nbytes(be2)),
    )

    out = pl.pallas_call(
        _ffn_kernel,
        out_shape=jax.ShapeDtypeStruct((n, d_in), x.dtype),
        grid_spec=pltpu.PrefetchScalarGridSpec(
            num_scalar_prefetch=0,
            grid=(num_row_tiles, num_h_chunks),
            in_specs=[
                pl.BlockSpec((tile_m_eff, d_in), lambda i, k: (i, 0)),   # x rows
                pl.BlockSpec((1, d_in), lambda i, k: (0, 0)),            # gamma
                pl.BlockSpec((1, d_in), lambda i, k: (0, 0)),            # beta
                pl.BlockSpec((d_in, tile_h_eff), lambda i, k: (0, k)),   # W1 panel
                pl.BlockSpec((1, tile_h_eff), lambda i, k: (0, k)),      # b1 chunk
                pl.BlockSpec((tile_h_eff, d_in), lambda i, k: (k, 0)),   # W2 panel
                pl.BlockSpec((1, d_in), lambda i, k: (0, 0)),            # b2
            ],
            out_specs=pl.BlockSpec((tile_m_eff, d_in), lambda i, k: (i, 0)),
            scratch_shapes=[
                pltpu.VMEM((tile_m_eff, d_in), mm_dtype),     # normalized rows
                pltpu.VMEM((tile_m_eff, d_in), jnp.float32),  # f32 accumulator
            ],
        ),
        compiler_params=pltpu.CompilerParams(
            dimension_semantics=("parallel", "arbitrary"),
            vmem_limit_bytes=_vmem_limit_bytes(),
        ),
        cost_estimate=cost,
    )(x2, g2, be2, w1c, b1r, w2c, b2r)

    return out.reshape(batch, seq, d_in)


def positionwise_ffn(x, ln_gamma, ln_beta, w1, b1, w2, b2, *,
                     tile_m=512, tile_h=1024):
    """x: [batch, seq, d_in] -> [batch, seq, d_in].

    Weights use the JAX convention: W1 [d_in, d_hid], W2 [d_hid, d_in]
    (y = x @ W + b).  Eval-mode semantics (dropout is identity).
    """
    return _positionwise_ffn(x, ln_gamma, ln_beta, w1, b1, w2, b2,
                             tile_m=tile_m, tile_h=tile_h)


def _reference_f32(x, ln_gamma, ln_beta, w1, b1, w2, b2):
    """Faithful f32 reference of the PyTorch forward (eval mode)."""
    xf = x.astype(jnp.float32)
    mean = jnp.mean(xf, axis=-1, keepdims=True)
    var = jnp.mean((xf - mean) ** 2, axis=-1, keepdims=True)
    xn = (xf - mean) / jnp.sqrt(var + 1e-6) * ln_gamma + ln_beta
    h = jax.nn.gelu(xn @ w1 + b1, approximate=False)
    y = h @ w2 + b2
    return (y + xf).astype(x.dtype)


def _reference_bf16_matmul(x, ln_gamma, ln_beta, w1, b1, w2, b2):
    """Same math with the kernel's dtype strategy (bf16 MXU operands, f32 acc)."""
    xf = x.astype(jnp.float32)
    mean = jnp.mean(xf, axis=-1, keepdims=True)
    xc = xf - mean
    var = jnp.mean(xc * xc, axis=-1, keepdims=True)
    xn = xc * lax.rsqrt(var + 1e-6) * ln_gamma + ln_beta
    h = jnp.dot(xn.astype(jnp.bfloat16), w1.astype(jnp.bfloat16),
                preferred_element_type=jnp.float32) + b1
    h = jax.nn.gelu(h, approximate=False)
    y = jnp.dot(h.astype(jnp.bfloat16), w2.astype(jnp.bfloat16),
                preferred_element_type=jnp.float32) + b2
    return (y + xf).astype(x.dtype)


if __name__ == "__main__":
    # Small, lane-dense shapes.  n = batch*seq = 144 with tile_m=64 exercises
    # a ragged last row tile, and d_hid=512 with tile_h=256 exercises the
    # two-chunk accumulation path (grid = (3, 2)).
    batch, seq, d_in, d_hid = 2, 72, 256, 512

    key = jax.random.PRNGKey(0)
    kx, k1, k2, k3, k4, k5, k6 = jax.random.split(key, 7)

    x = jax.random.normal(kx, (batch, seq, d_in), dtype=jnp.float32)

    # Deterministic parameter init (nn.Linear-like scaling).
    w1 = jax.random.normal(k1, (d_in, d_hid), dtype=jnp.float32) * (d_in ** -0.5)
    b1 = jax.random.normal(k2, (d_hid,), dtype=jnp.float32) * 0.01
    w2 = jax.random.normal(k3, (d_hid, d_in), dtype=jnp.float32) * (d_hid ** -0.5)
    b2 = jax.random.normal(k4, (d_in,), dtype=jnp.float32) * 0.01
    ln_gamma = 1.0 + 0.1 * jax.random.normal(k5, (d_in,), dtype=jnp.float32)
    ln_beta = 0.01 * jax.random.normal(k6, (d_in,), dtype=jnp.float32)

    out = positionwise_ffn(x, ln_gamma, ln_beta, w1, b1, w2, b2,
                           tile_m=64, tile_h=256)
    out = jax.block_until_ready(out)
    assert out.shape == (batch, seq, d_in)

    # Tight check vs. a reference that mimics the kernel's bf16-MXU strategy.
    ref_mm = _reference_bf16_matmul(x, ln_gamma, ln_beta, w1, b1, w2, b2)
    err_mm = float(jnp.max(jnp.abs(out - ref_mm)))
    assert jnp.allclose(out, ref_mm, atol=5e-3, rtol=5e-3), (
        f"mismatch vs bf16-matmul reference (max abs err {err_mm})")

    # Loose sanity check vs. the full-f32 PyTorch-semantics reference
    # (bf16 MXU operands introduce ~1e-2-scale absolute differences).
    ref_f32 = _reference_f32(x, ln_gamma, ln_beta, w1, b1, w2, b2)
    err_f32 = float(jnp.max(jnp.abs(out - ref_f32)))
    assert jnp.allclose(out, ref_f32, atol=1.5e-1, rtol=1.5e-1), (
        f"mismatch vs f32 reference (max abs err {err_f32})")

    print("KERNEL_OK")
</pallas_src>

<mosaic_0001>
module attributes {stable_mosaic.version = 11 : i64} {
  func.func @_ffn_kernel(%arg0: i32, %arg1: i32, %arg2: memref<64x256xf32, #tpu.memory_space<vmem>>, %arg3: memref<1x256xf32, #tpu.memory_space<vmem>>, %arg4: memref<1x256xf32, #tpu.memory_space<vmem>>, %arg5: memref<256x256xbf16, #tpu.memory_space<vmem>>, %arg6: memref<1x256xf32, #tpu.memory_space<vmem>>, %arg7: memref<256x256xbf16, #tpu.memory_space<vmem>>, %arg8: memref<1x256xf32, #tpu.memory_space<vmem>>, %arg9: memref<64x256xf32, #tpu.memory_space<vmem>>, %arg10: memref<64x256xbf16, #tpu.memory_space<vmem>>, %arg11: memref<64x256xf32, #tpu.memory_space<vmem>>) attributes {dimension_semantics = [#tpu.dimension_semantics<parallel>, #tpu.dimension_semantics<arbitrary>], iteration_bounds = array<i64: 3, 2>, scalar_prefetch = 0 : i64, scratch_operands = 2 : i64, tpu.core_type = #tpu.core_type<tc>, window_params = [{transform_indices = @transform_0, window_bounds = array<i64: 64, 256>}, {pipeline_mode = #tpu.pipeline_mode<synchronous>, transform_indices = @transform_1, window_bounds = array<i64: 1, 256>}, {pipeline_mode = #tpu.pipeline_mode<synchronous>, transform_indices = @transform_2, window_bounds = array<i64: 1, 256>}, {transform_indices = @transform_3, window_bounds = array<i64: 256, 256>}, {transform_indices = @transform_4, window_bounds = array<i64: 1, 256>}, {transform_indices = @transform_5, window_bounds = array<i64: 256, 256>}, {pipeline_mode = #tpu.pipeline_mode<synchronous>, transform_indices = @transform_6, window_bounds = array<i64: 1, 256>}, {transform_indices = @transform_7, window_bounds = array<i64: 64, 256>}]} {
    %c0_i32 = arith.constant 0 : i32
    %0 = arith.cmpi eq, %arg1, %c0_i32 : i32
    %1 = arith.extui %0 : i1 to i32
    %c0_i32_0 = arith.constant 0 : i32
    %2 = arith.cmpi ne, %1, %c0_i32_0 : i32
    scf.if %2 {
      %c0_17 = arith.constant 0 : index
      %c0_18 = arith.constant 0 : index
      %26 = vector.load %arg2[%c0_17, %c0_18] : memref<64x256xf32, #tpu.memory_space<vmem>>, vector<64x256xf32>
      %cst_19 = arith.constant dense<0.000000e+00> : vector<64xf32>
      %27 = vector.multi_reduction <add>, %26, %cst_19 [1] : vector<64x256xf32> to vector<64xf32>
      %28 = vector.shape_cast %27 : vector<64xf32> to vector<64x1xf32>
      %cst_20 = arith.constant 3.906250e-03 : f32
      %29 = vector.broadcast %cst_20 : f32 to vector<64x1xf32>
      %30 = arith.mulf %28, %29 : vector<64x1xf32>
      %31 = vector.broadcast %30 : vector<64x1xf32> to vector<64x256xf32>
      %32 = arith.subf %26, %31 : vector<64x256xf32>
      %33 = arith.mulf %32, %32 : vector<64x256xf32>
      %cst_21 = arith.constant dense<0.000000e+00> : vector<64xf32>
      %34 = vector.multi_reduction <add>, %33, %cst_21 [1] : vector<64x256xf32> to vector<64xf32>
      %35 = vector.shape_cast %34 : vector<64xf32> to vector<64x1xf32>
      %cst_22 = arith.constant 3.906250e-03 : f32
      %36 = vector.broadcast %cst_22 : f32 to vector<64x1xf32>
      %37 = arith.mulf %35, %36 : vector<64x1xf32>
      %cst_23 = arith.constant 9.99999997E-7 : f32
      %38 = vector.broadcast %cst_23 : f32 to vector<64x1xf32>
      %39 = arith.addf %37, %38 : vector<64x1xf32>
      %40 = math.rsqrt %39 : vector<64x1xf32>
      %41 = vector.broadcast %40 : vector<64x1xf32> to vector<64x256xf32>
      %42 = arith.mulf %32, %41 : vector<64x256xf32>
      %c0_24 = arith.constant 0 : index
      %c0_25 = arith.constant 0 : index
      %43 = vector.load %arg3[%c0_24, %c0_25] : memref<1x256xf32, #tpu.memory_space<vmem>>, vector<1x256xf32>
      %44 = vector.broadcast %43 : vector<1x256xf32> to vector<64x256xf32>
      %45 = arith.mulf %42, %44 : vector<64x256xf32>
      %c0_26 = arith.constant 0 : index
      %c0_27 = arith.constant 0 : index
      %46 = vector.load %arg4[%c0_26, %c0_27] : memref<1x256xf32, #tpu.memory_space<vmem>>, vector<1x256xf32>
      %47 = vector.broadcast %46 : vector<1x256xf32> to vector<64x256xf32>
      %48 = arith.addf %45, %47 : vector<64x256xf32>
      %49 = arith.truncf %48 : vector<64x256xf32> to vector<64x256xbf16>
      %c0_28 = arith.constant 0 : index
      %c0_29 = arith.constant 0 : index
      %50 = vector.load %arg10[%c0_28, %c0_29] : memref<64x256xbf16, #tpu.memory_space<vmem>>, vector<64x256xbf16>
      tpu.vector_store %arg10[%c0_28, %c0_29], %49 {strides = array<i32>} : memref<64x256xbf16, #tpu.memory_space<vmem>>, vector<64x256xbf16>,
      %cst_30 = arith.constant 0.000000e+00 : f32
      %51 = vector.broadcast %cst_30 : f32 to vector<64x256xf32>
      %c0_31 = arith.constant 0 : index
      %c0_32 = arith.constant 0 : index
      %52 = vector.load %arg11[%c0_31, %c0_32] : memref<64x256xf32, #tpu.memory_space<vmem>>, vector<64x256xf32>
      tpu.vector_store %arg11[%c0_31, %c0_32], %51 {strides = array<i32>} : memref<64x256xf32, #tpu.memory_space<vmem>>, vector<64x256xf32>,
    } else {
    }
    %c0 = arith.constant 0 : index
    %c0_1 = arith.constant 0 : index
    %3 = vector.load %arg10[%c0, %c0_1] : memref<64x256xbf16, #tpu.memory_space<vmem>>, vector<64x256xbf16>
    %c0_2 = arith.constant 0 : index
    %c0_3 = arith.constant 0 : index
    %4 = vector.load %arg5[%c0_2, %c0_3] : memref<256x256xbf16, #tpu.memory_space<vmem>>, vector<256x256xbf16>
    %cst = arith.constant dense<0.000000e+00> : vector<64x256xf32>
    %5 = tpu.matmul %3, %4, %cst {dimension_numbers = #tpu.dot_dimension_numbers<[1], [0], [0], [1], [0, 0, 1, 1], [], []>} : vector<64x256xbf16>, vector<256x256xbf16>, vector<64x256xf32> -> vector<64x256xf32>
    %c0_4 = arith.constant 0 : index
    %c0_5 = arith.constant 0 : index
    %6 = vector.load %arg6[%c0_4, %c0_5] : memref<1x256xf32, #tpu.memory_space<vmem>>, vector<1x256xf32>
    %7 = vector.broadcast %6 : vector<1x256xf32> to vector<64x256xf32>
    %8 = arith.addf %5, %7 : vector<64x256xf32>
    %cst_6 = arith.constant 5.000000e-01 : f32
    %9 = vector.broadcast %cst_6 : f32 to vector<64x256xf32>
    %10 = arith.mulf %9, %8 : vector<64x256xf32>
    %cst_7 = arith.constant 0.707106769 : f32
    %11 = vector.broadcast %cst_7 : f32 to vector<64x256xf32>
    %12 = arith.mulf %8, %11 : vector<64x256xf32>
    %13 = math.erf %12 : vector<64x256xf32>
    %cst_8 = arith.constant 1.000000e+00 : f32
    %14 = vector.broadcast %cst_8 : f32 to vector<64x256xf32>
    %15 = arith.addf %14, %13 : vector<64x256xf32>
    %16 = arith.mulf %10, %15 : vector<64x256xf32>
    %c0_9 = arith.constant 0 : index
    %c0_10 = arith.constant 0 : index
    %17 = vector.load %arg11[%c0_9, %c0_10] : memref<64x256xf32, #tpu.memory_space<vmem>>, vector<64x256xf32>
    %18 = arith.truncf %16 : vector<64x256xf32> to vector<64x256xbf16>
    %c0_11 = arith.constant 0 : index
    %c0_12 = arith.constant 0 : index
    %19 = vector.load %arg7[%c0_11, %c0_12] : memref<256x256xbf16, #tpu.memory_space<vmem>>, vector<256x256xbf16>
    %cst_13 = arith.constant dense<0.000000e+00> : vector<64x256xf32>
    %20 = tpu.matmul %18, %19, %cst_13 {dimension_numbers = #tpu.dot_dimension_numbers<[1], [0], [0], [1], [0, 0, 1, 1], [], []>} : vector<64x256xbf16>, vector<256x256xbf16>, vector<64x256xf32> -> vector<64x256xf32>
    %21 = arith.addf %17, %20 : vector<64x256xf32>
    %c0_14 = arith.constant 0 : index
    %c0_15 = arith.constant 0 : index
    %22 = vector.load %arg11[%c0_14, %c0_15] : memref<64x256xf32, #tpu.memory_space<vmem>>, vector<64x256xf32>
    tpu.vector_store %arg11[%c0_14, %c0_15], %21 {strides = array<i32>} : memref<64x256xf32, #tpu.memory_space<vmem>>, vector<64x256xf32>,
    %c1_i32 = arith.constant 1 : i32
    %23 = arith.cmpi eq, %arg1, %c1_i32 : i32
    %24 = arith.extui %23 : i1 to i32
    %c0_i32_16 = arith.constant 0 : i32
    %25 = arith.cmpi ne, %24, %c0_i32_16 : i32
    scf.if %25 {
      %c0_17 = arith.constant 0 : index
      %c0_18 = arith.constant 0 : index
      %26 = vector.load %arg11[%c0_17, %c0_18] : memref<64x256xf32, #tpu.memory_space<vmem>>, vector<64x256xf32>
      %c0_19 = arith.constant 0 : index
      %c0_20 = arith.constant 0 : index
      %27 = vector.load %arg8[%c0_19, %c0_20] : memref<1x256xf32, #tpu.memory_space<vmem>>, vector<1x256xf32>
      %28 = vector.broadcast %27 : vector<1x256xf32> to vector<64x256xf32>
      %29 = arith.addf %26, %28 : vector<64x256xf32>
      %c0_21 = arith.constant 0 : index
      %c0_22 = arith.constant 0 : index
      %30 = vector.load %arg2[%c0_21, %c0_22] : memref<64x256xf32, #tpu.memory_space<vmem>>, vector<64x256xf32>
      %31 = arith.addf %29, %30 : vector<64x256xf32>
      %c0_23 = arith.constant 0 : index
      %c0_24 = arith.constant 0 : index
      %32 = vector.load %arg9[%c0_23, %c0_24] : memref<64x256xf32, #tpu.memory_space<vmem>>, vector<64x256xf32>
      tpu.vector_store %arg9[%c0_23, %c0_24], %31 {strides = array<i32>} : memref<64x256xf32, #tpu.memory_space<vmem>>, vector<64x256xf32>,
    } else {
    }
    return
  }
  func.func @transform_0(%arg0: i32, %arg1: i32) -> (i32, i32) {
    %c0_i32 = arith.constant 0 : i32
    %c0_i32_0 = arith.constant 0 : i32
    return %arg0, %c0_i32 : i32, i32
  }
  func.func @transform_1(%arg0: i32, %arg1: i32) -> (i32, i32) {
    %c0_i32 = arith.constant 0 : i32
    %c0_i32_0 = arith.constant 0 : i32
    %c0_i32_1 = arith.constant 0 : i32
    return %c0_i32, %c0_i32_0 : i32, i32
  }
  func.func @transform_2(%arg0: i32, %arg1: i32) -> (i32, i32) {
    %c0_i32 = arith.constant 0 : i32
    %c0_i32_0 = arith.constant 0 : i32
    %c0_i32_1 = arith.constant 0 : i32
    return %c0_i32, %c0_i32_0 : i32, i32
  }
  func.func @transform_3(%arg0: i32, %arg1: i32) -> (i32, i32) {
    %c0_i32 = arith.constant 0 : i32
    %c0_i32_0 = arith.constant 0 : i32
    return %c0_i32, %arg1 : i32, i32
  }
  func.func @transform_4(%arg0: i32, %arg1: i32) -> (i32, i32) {
    %c0_i32 = arith.constant 0 : i32
    %c0_i32_0 = arith.constant 0 : i32
    return %c0_i32, %arg1 : i32, i32
  }
  func.func @transform_5(%arg0: i32, %arg1: i32) -> (i32, i32) {
    %c0_i32 = arith.constant 0 : i32
    %c0_i32_0 = arith.constant 0 : i32
    return %arg1, %c0_i32 : i32, i32
  }
  func.func @transform_6(%arg0: i32, %arg1: i32) -> (i32, i32) {
    %c0_i32 = arith.constant 0 : i32
    %c0_i32_0 = arith.constant 0 : i32
    %c0_i32_1 = arith.constant 0 : i32
    return %c0_i32, %c0_i32_0 : i32, i32
  }
  func.func @transform_7(%arg0: i32, %arg1: i32) -> (i32, i32) {
    %c0_i32 = arith.constant 0 : i32
    %c0_i32_0 = arith.constant 0 : i32
    return %arg0, %c0_i32 : i32, i32
  }
}

</mosaic_0001>

<bundles_post_ra>
// kernel: _positionwise_ffn.1
= control target key start
LH: loop header
LB: loop body
LE: loop exit
PB: predicated region body
PF: predicated region fallthrough
CT: control target
= control target key end

     0   :  { %s2777_s0 = inlined_call_operand.vmem [shape: f32[144,256], index: 0, kind: input, shape index: {}]   ;;  %s2778_s1 = inlined_call_operand.vmem [shape: f32[1,256], index: 1, kind: input, shape index: {}]   ;;  %s2779_s2 = inlined_call_operand.vmem [shape: f32[1,256], index: 2, kind: input, shape index: {}]   ;;  %s2780_s3 = inlined_call_operand.vmem [shape: bf16[256,512], index: 3, kind: input, shape index: {}]   ;;  %s2781_s4 = inlined_call_operand.vmem [shape: f32[1,512], index: 4, kind: input, shape index: {}]   ;;  %s2782_s5 = inlined_call_operand.vmem [shape: bf16[512,256], index: 5, kind: input, shape index: {}]   ;;  %s2783_s6 = inlined_call_operand.vmem [shape: f32[1,256], index: 6, kind: input, shape index: {}]   ;;  %s2784_s7 = inlined_call_operand.hbm [shape: f32[144,256], index: 7, kind: output, shape index: {}]  }
   0x1   :  { %2793 = sst [smem:[#allocation17_spill]] %s2780_s3 }
   0x2   :  { %12 = vsyncpa [#allocation6], 0 }
   0x3   :  { %14 = vsyncpa [#allocation6 + $0x1], 0  ;;  %s2190_s24 = smov 0   ;;  %s2192_s25 = smov 0  }
   0x4   :  { %s2194_s26 = smov 0   ;;  %s2196_s27 = smov 0  }
   0x5   :  { %s2198_s28 = smov 0   ;;  %s2200_s29 = smov 0  }
   0x6   :  { %s2202_s30 = smov 0   ;;  %s2204_s8 = smov 0  }
   0x7   :  { %s2206_s9 = smov 0   ;;  %s2208_s10 = smov 0  }
   0x8 LB: > { %2794 = sst [smem:[#allocation8_spill]] %s2116_s26  ;;  %s1701_s11 = sadd.s32 4294967295, %s2144_s10   ;;  %s2144_s10 = sphi %s2208_s10, %s20_s10   ;;  %s2140_s9 = sphi %s2206_s9, %s2816_s9   ;;  %s2136_s8 = sphi %s2204_s8, %s2815_s8   ;;  %s2132_s30 = sphi %s2202_s30, %s2814_s30   ;;  %s2128_s29 = sphi %s2200_s29, %s2813_s29   ;;  %s2124_s28 = sphi %s2198_s28, %s2812_s28   ;;  %s2120_s27 = sphi %s2196_s27, %s2811_s27   ;;  %s2116_s26 = sphi %s2194_s26, %s2810_s26   ;;  %s2112_s25 = sphi %s2192_s25, %s2818_s25   ;;  %s2108_s24 = sphi %s2190_s24, %s2817_s24  }
   0x9   : > { %2795 = sst [smem:[#allocation9_spill]] %s2124_s28  ;;  %s1702_s12 = sadd.s32 4294967294, %s2144_s10  }
   0xa   : > { %2796 = sst [smem:[#allocation10_spill]] %s2136_s8  ;;  %s29_s13 = sadd.s32 1, %s2136_s8 }
   0xb   : > { %2797 = sst [smem:[#allocation11_spill]] %s2140_s9  ;;  %s32_s14 = sadd.s32 1, %s2140_s9 }
   0xc   : > { %p30_p0 = scmp.ge.s32.totalorder %s29_s13, 2  ;;  %s107_s15 = sadd.s32 1, %s2124_s28 }
   0xd   : > { %p114_p1 = scmp.ne.s32.totalorder %s2124_s28, %s2120_s27  ;;  %p115_p2 = scmp.eq.s32.totalorder %s2144_s10, 0 }
   0xe   : > { %s2820_s13 = smov (%p30_p0, %s29_s13), 0  ;;  %s2822_s14 = smov (!%p30_p0, %s32_s14), %s2140_s9 }
   0xf   : > { %2798 = sst [smem:[#allocation12_spill]] %s2820_s13  ;;  %s104_s16 = ssub.s32 %s2136_s8, %s2820_s13 }
  0x10   : > { %p2253_p3 = por %p115_p2, %p114_p1  ;;  %p34_p4 = scmp.ge.s32.totalorder %s2822_s14, 3 }
  0x11   : > { %p105_p5 = scmp.eq.s32.totalorder %s104_s16, 0  ;;  %s206_s18 = sadd.s32 1, %s2116_s26 }
  0x12   : > { %p216_p6 = scmp.ne.s32.totalorder %s2116_s26, %s2112_s25  ;;  %s2824_s14 = smov (%p34_p4, %s2822_s14), 0 }
  0x13   : > { %2800 = sst [smem:[#allocation13_spill]] %s2824_s14  ;;  %s203_s20 = ssub.s32 %s2140_s9, %s2824_s14 }
  0x14   : > { %s2263_s19 = scalar_select %p105_p5, %s2124_s28, %s107_s15  }
  0x15   : > { %p217_p7 = scmp.eq.s32.totalorder %s1701_s11, 5  ;;  %p204_p8 = scmp.eq.s32.totalorder %s203_s20, 0 }
  0x16   : > { %2801 = sst [smem:[#allocation14_spill]] %s2263_s19  ;;  %p222_p9 = scmp.ne.s32.totalorder %s2112_s25, %s2108_s24 }
  0x17   : > { %p2269_p10 = por %p217_p7, %p216_p6  ;;  %p223_p11 = scmp.eq.s32.totalorder %s1702_s12, 5 }
  0x18   : > { %s2274_s22 = scalar_select %p204_p8, %s2116_s26, %s206_s18  }
  0x19   : > { %p2276_p12 = por %p223_p11, %p222_p9  ;;  %p1704_p13 = scmp.ge.s32.totalorder %s2144_s10, 6 }
  0x1a   : > { %2803 = sst [smem:[#allocation15_spill]] %s2274_s22 }
  0x1b   : > { %s2804_s23 = scalar_select %p2276_p12, 1, 0 }
  0x1c   : > { %248 = sbr.rel (%p1704_p13) target bundleno = 61 (0x3d), region = 28 }
  0x1d   : > { %2805 = sst [smem:[#allocation16_spill]] %s2804_s23 }
  0x23   : > { %271 = sbr.rel (!%p2253_p3) target bundleno = 61 (0x3d), region = 36  ;;  %s273_s11 = sand.u32 (%p2253_p3), 1, %s2124_s28  }
  0x24   : > { %s1795_s15 = sshll.u32 (%p2253_p3), %s2136_s8, 3  ;;  %s1705_s16 = sshll.u32 (%p2253_p3), %s273_s11, 8 }
  0x25   : > { %s2806_s3 = sld [smem:[#allocation17_spill]] (%p2253_p3)  ;;  %s2293_s17 = scalar_lea.vmem (%p2253_p3), [#allocation4], %s1705_s16 }
  0x2b   : > { %s2288_s12 = scalar_lea.vmem %s2806_s3, %s1795_s15 }
  0x2c   : > { %v368_v0 = vld [vmem:[%s2288_s12] sm:$0xff]  ;;  %v370_v1 = vld [vmem:[%s2288_s12 + $0x10] sm:$0xff] }
  0x2d   : > { %v372_v2 = vld [vmem:[%s2288_s12 + $0x20] sm:$0xff]  ;;  %369 = vst [vmem:[%s2293_s17] sm:$0xff] %v368_v0  ;;  %371 = vst [vmem:[%s2293_s17 + $0x8] sm:$0xff] %v370_v1  ;;  %v374_v3 = vld [vmem:[%s2288_s12 + $0x30] sm:$0xff] }
  0x2e   : > { %373 = vst [vmem:[%s2293_s17 + $0x10] sm:$0xff] %v372_v2  ;;  %v376_v4 = vld [vmem:[%s2288_s12 + $0x40] sm:$0xff]  ;;  %v378_v5 = vld [vmem:[%s2288_s12 + $0x50] sm:$0xff]  ;;  %375 = vst [vmem:[%s2293_s17 + $0x18] sm:$0xff] %v374_v3 }
  0x2f   : > { %377 = vst [vmem:[%s2293_s17 + $0x20] sm:$0xff] %v376_v4  ;;  %379 = vst [vmem:[%s2293_s17 + $0x28] sm:$0xff] %v378_v5  ;;  %v380_v6 = vld [vmem:[%s2288_s12 + $0x60] sm:$0xff]  ;;  %v382_v7 = vld [vmem:[%s2288_s12 + $0x70] sm:$0xff] }
  0x30   : > { %v384_v8 = vld [vmem:[%s2288_s12 + $0x80] sm:$0xff]  ;;  %381 = vst [vmem:[%s2293_s17 + $0x30] sm:$0xff] %v380_v6  ;;  %383 = vst [vmem:[%s2293_s17 + $0x38] sm:$0xff] %v382_v7  ;;  %v386_v9 = vld [vmem:[%s2288_s12 + $0x90] sm:$0xff] }
  0x31   : > { %385 = vst [vmem:[%s2293_s17 + $0x40] sm:$0xff] %v384_v8  ;;  %v388_v10 = vld [vmem:[%s2288_s12 + $0xa0] sm:$0xff]  ;;  %v390_v11 = vld [vmem:[%s2288_s12 + $0xb0] sm:$0xff]  ;;  %387 = vst [vmem:[%s2293_s17 + $0x48] sm:$0xff] %v386_v9 }
  0x32   : > { %389 = vst [vmem:[%s2293_s17 + $0x50] sm:$0xff] %v388_v10  ;;  %391 = vst [vmem:[%s2293_s17 + $0x58] sm:$0xff] %v390_v11  ;;  %v392_v12 = vld [vmem:[%s2288_s12 + $0xc0] sm:$0xff]  ;;  %v394_v13 = vld [vmem:[%s2288_s12 + $0xd0] sm:$0xff] }
  0x33   : > { %v396_v14 = vld [vmem:[%s2288_s12 + $0xe0] sm:$0xff]  ;;  %393 = vst [vmem:[%s2293_s17 + $0x60] sm:$0xff] %v392_v12  ;;  %395 = vst [vmem:[%s2293_s17 + $0x68] sm:$0xff] %v394_v13  ;;  %v398_v15 = vld [vmem:[%s2288_s12 + $0xf0] sm:$0xff] }
  0x34   : > { %397 = vst [vmem:[%s2293_s17 + $0x70] sm:$0xff] %v396_v14  ;;  %v400_v16 = vld [vmem:[%s2288_s12 + $0x100] sm:$0xff]  ;;  %v402_v17 = vld [vmem:[%s2288_s12 + $0x110] sm:$0xff]  ;;  %399 = vst [vmem:[%s2293_s17 + $0x78] sm:$0xff] %v398_v15 }
  0x35   : > { %401 = vst [vmem:[%s2293_s17 + $0x80] sm:$0xff] %v400_v16  ;;  %403 = vst [vmem:[%s2293_s17 + $0x88] sm:$0xff] %v402_v17  ;;  %v404_v18 = vld [vmem:[%s2288_s12 + $0x120] sm:$0xff]  ;;  %v406_v19 = vld [vmem:[%s2288_s12 + $0x130] sm:$0xff] }
  0x36   : > { %v408_v20 = vld [vmem:[%s2288_s12 + $0x140] sm:$0xff]  ;;  %405 = vst [vmem:[%s2293_s17 + $0x90] sm:$0xff] %v404_v18  ;;  %407 = vst [vmem:[%s2293_s17 + $0x98] sm:$0xff] %v406_v19  ;;  %v410_v21 = vld [vmem:[%s2288_s12 + $0x150] sm:$0xff] }
  0x37   : > { %409 = vst [vmem:[%s2293_s17 + $0xa0] sm:$0xff] %v408_v20  ;;  %v412_v22 = vld [vmem:[%s2288_s12 + $0x160] sm:$0xff]  ;;  %v414_v23 = vld [vmem:[%s2288_s12 + $0x170] sm:$0xff]  ;;  %411 = vst [vmem:[%s2293_s17 + $0xa8] sm:$0xff] %v410_v21 }
  0x38   : > { %413 = vst [vmem:[%s2293_s17 + $0xb0] sm:$0xff] %v412_v22  ;;  %415 = vst [vmem:[%s2293_s17 + $0xb8] sm:$0xff] %v414_v23  ;;  %v416_v24 = vld [vmem:[%s2288_s12 + $0x180] sm:$0xff]  ;;  %v418_v25 = vld [vmem:[%s2288_s12 + $0x190] sm:$0xff] }
  0x39   : > { %v420_v26 = vld [vmem:[%s2288_s12 + $0x1a0] sm:$0xff]  ;;  %417 = vst [vmem:[%s2293_s17 + $0xc0] sm:$0xff] %v416_v24  ;;  %419 = vst [vmem:[%s2293_s17 + $0xc8] sm:$0xff] %v418_v25  ;;  %v422_v27 = vld [vmem:[%s2288_s12 + $0x1b0] sm:$0xff] }
  0x3a   : > { %421 = vst [vmem:[%s2293_s17 + $0xd0] sm:$0xff] %v420_v26  ;;  %v424_v28 = vld [vmem:[%s2288_s12 + $0x1c0] sm:$0xff]  ;;  %v426_v29 = vld [vmem:[%s2288_s12 + $0x1d0] sm:$0xff]  ;;  %423 = vst [vmem:[%s2293_s17 + $0xd8] sm:$0xff] %v422_v27 }
  0x3b   : > { %425 = vst [vmem:[%s2293_s17 + $0xe0] sm:$0xff] %v424_v28  ;;  %427 = vst [vmem:[%s2293_s17 + $0xe8] sm:$0xff] %v426_v29  ;;  %v428_v30 = vld [vmem:[%s2288_s12 + $0x1e0] sm:$0xff]  ;;  %v430_v31 = vld [vmem:[%s2288_s12 + $0x1f0] sm:$0xff] }
  0x3c   : > { %429 = vst [vmem:[%s2293_s17 + $0xf0] sm:$0xff] %v428_v30  ;;  %431 = vst [vmem:[%s2293_s17 + $0xf8] sm:$0xff] %v430_v31 }
  0x3d PF: > { %p1708_p0 = scmp.ge.s32.totalorder %s2144_s10, 1  ;;  %p454_p1 = scmp.lt.s32.totalorder %s2144_s10, 7 }
  0x3f   : > { %p455_p2 = pnand %p1708_p0, %p454_p1 }
  0x40   : > { %s461_s14 = sand.u32 (!%p455_p2), 1, %s2120_s27   ;;  %s2787_s18 = sand.u32 (!%p455_p2), 1, %s2112_s25  }
  0x41   : > { %458 = sbr.rel (%p455_p2) target bundleno = 1002 (0x3ea), region = 82  ;;  %s1709_s11 = sshll.u32 (!%p455_p2), %s461_s14, 8 }
  0x42   : > { %s1710_s15 = sshll.u32 (!%p455_p2), %s2787_s18, 7  ;;  %s2363_s16 = sshll.u32 (!%p455_p2), %s2132_s30, 3 }
  0x43   : > { %s1714_s20 = sshll.u32 (!%p455_p2), %s2128_s29, 1  ;;  %p519_p3 = scmp.lt.s32.totalorder (!%p455_p2), %s2363_s16, 17 }
  0x44   : > { %p532_p4 = scmp.lt.s32.totalorder (!%p455_p2), %s1714_s20, 3  ;;  %s1715_s12 = sshll.u32 (!%p455_p2), %s2128_s29, 5 }
  0x45   : > { %p537_p5 = scmp.lt.s32.totalorder (!%p455_p2), %s1715_s12, 63  ;;  %s2385_s23 = scalar_lea.vmem (!%p455_p2), [#allocation4], %s1709_s11 }
  0x46   : > { %p1718_p6 = scmp.ne.s32.totalorder (!%p455_p2), %s2128_s29, 0 }
  0x48   : > { %s520_s17 = scalar_select %p519_p3, %s2363_s16, 17 }
  0x49   : > { %s2826_s20 = smov (!%p532_p4, %s1714_s20), 3  ;;  %s2828_s12 = smov (!%p537_p5, %s1715_s12), 63 }
  0x4a   : > { %s1796_s3 = sshll.u32 %s520_s17, 4  ;;  %s534_s8 = scalar_lea.vmem %s2781_s4, %s2826_s20 }
  0x4b   : > { %s2374_s14 = scalar_lea.vmem %s2777_s0, %s1796_s3  ;;  %s1797_s19 = sshll.u32 %s2828_s12, 3 }
  0x4c   : > { %s2383_s26 = scalar_lea.vmem %s2782_s5, %s1797_s19  ;;  %s2387_s17 = scalar_lea.vmem [#allocation5], %s1710_s15  ;;  %v553_v32 = vld [vmem:[%s2374_s14] sm:$0xff] (!%p1718_p6)  ;;  %v554_v33 = vld [vmem:[%s2374_s14 + $0x8] sm:$0xff] (!%p1718_p6)  ;;  %v555_v37 = vld [vmem:[%s2374_s14 + $0x10] sm:$0xff] (!%p1718_p6) }
  0x4d   : > { %552 = sbr.rel (%p1718_p6) target bundleno = 411 (0x19b), region = 90  ;;  %v557_v34 = vld [vmem:[%s2374_s14 + $0x20] sm:$0xff] (!%p1718_p6)  ;;  %v569_v35 = vadd.f32 (!%p1718_p6), %v554_v33, %v553_v32  ;;  %v558_v36 = vld [vmem:[%s2374_s14 + $0x28] sm:$0xff] (!%p1718_p6)  ;;  %v556_v38 = vld [vmem:[%s2374_s14 + $0x18] sm:$0xff] (!%p1718_p6) }
  0x4e   : > { %v575_v39 = vadd.f32 (!%p1718_p6), %v558_v36, %v557_v34  ;;  %v559_v40 = vld [vmem:[%s2374_s14 + $0x30] sm:$0xff] (!%p1718_p6)  ;;  %v560_v41 = vld [vmem:[%s2374_s14 + $0x38] sm:$0xff] (!%p1718_p6)  ;;  %v572_v42 = vadd.f32 (!%p1718_p6), %v556_v38, %v555_v37  ;;  %v561_v44 = vld [vmem:[%s2374_s14 + $0x40] sm:$0xff] (!%p1718_p6) }
  0x4f   : > { %570 = vadd.xlane.f32.xlu0 (!%p1718_p6), %v569_v35  ;;  %v578_v43 = vadd.f32 (!%p1718_p6), %v560_v41, %v559_v40  ;;  %v562_v45 = vld [vmem:[%s2374_s14 + $0x48] sm:$0xff] (!%p1718_p6)  ;;  %v563_v46 = vld [vmem:[%s2374_s14 + $0x50] sm:$0xff] (!%p1718_p6)  ;;  %v564_v47 = vld [vmem:[%s2374_s14 + $0x58] sm:$0xff] (!%p1718_p6) }
  0x50   : > { %576 = vadd.xlane.f32.xlu1 (!%p1718_p6), %v575_v39  ;;  %v581_v48 = vadd.f32 (!%p1718_p6), %v562_v45, %v561_v44  ;;  %v584_v49 = vadd.f32 (!%p1718_p6), %v564_v47, %v563_v46  ;;  %v565_v50 = vld [vmem:[%s2374_s14 + $0x60] sm:$0xff] (!%p1718_p6)  ;;  %v566_v51 = vld [vmem:[%s2374_s14 + $0x68] sm:$0xff] (!%p1718_p6)  ;;  %v567_v52 = vld [vmem:[%s2374_s14 + $0x70] sm:$0xff] (!%p1718_p6) }
  0x51   : > { %v568_v53 = vld [vmem:[%s2374_s14 + $0x78] sm:$0xff] (!%p1718_p6)  ;;  %v587_v54 = vadd.f32 (!%p1718_p6), %v566_v51, %v565_v50 }
  0x52   : > { %v590_v55 = vadd.f32 (!%p1718_p6), %v568_v53, %v567_v52 }
  0x53   : > { %573 = vadd.xlane.f32.xlu0 (!%p1718_p6), %v572_v42 }
  0x54   : > { %579 = vadd.xlane.f32.xlu1 %v578_v43 }
  0x57   : > { %582 = vadd.xlane.f32.xlu0 %v581_v48  ;;  %v2146_v48 = vmov 0.0  }
  0x58   : > { %585 = vadd.xlane.f32.xlu1 %v584_v49  ;;  %769 = vst [vmem:[#allocation3] sm:$0xff] %v2146_v48  ;;  %770 = vst [vmem:[#allocation3 + $0x8] sm:$0xff] %v2146_v48 }
  0x59   : > { %771 = vst [vmem:[#allocation3 + $0x10] sm:$0xff] %v2146_v48  ;;  %772 = vst [vmem:[#allocation3 + $0x18] sm:$0xff] %v2146_v48 }
  0x5a   : > { %773 = vst [vmem:[#allocation3 + $0x20] sm:$0xff] %v2146_v48  ;;  %774 = vst [vmem:[#allocation3 + $0x28] sm:$0xff] %v2146_v48 }
  0x5b   : > { %588 = vadd.xlane.f32.xlu0 %v587_v54  ;;  %775 = vst [vmem:[#allocation3 + $0x30] sm:$0xff] %v2146_v48  ;;  %776 = vst [vmem:[#allocation3 + $0x38] sm:$0xff] %v2146_v48 }
  0x5c   : > { %591 = vadd.xlane.f32.xlu1 %v590_v55  ;;  %777 = vst [vmem:[#allocation3 + $0x40] sm:$0xff] %v2146_v48  ;;  %778 = vst [vmem:[#allocation3 + $0x48] sm:$0xff] %v2146_v48 }
  0x5d   : > { %779 = vst [vmem:[#allocation3 + $0x50] sm:$0xff] %v2146_v48  ;;  %780 = vst [vmem:[#allocation3 + $0x58] sm:$0xff] %v2146_v48 }
  0x5e   : > { %781 = vst [vmem:[#allocation3 + $0x60] sm:$0xff] %v2146_v48  ;;  %782 = vst [vmem:[#allocation3 + $0x68] sm:$0xff] %v2146_v48 }
  0x5f   : > { %783 = vst [vmem:[#allocation3 + $0x70] sm:$0xff] %v2146_v48  ;;  %784 = vst [vmem:[#allocation3 + $0x78] sm:$0xff] %v2146_v48 }
  0xdc   : > { %v571_v56 = vpop.xlane.xlu0 %570 }
  0xdd   : > { %v593_v57 = vmul.f32 0.00390625, %v571_v56  ;;  %v577_v58 = vpop.xlane.xlu1 %576 }
  0xde   : > { %v595_v59 = vmul.f32 0.00390625, %v577_v58 }
  0xdf   : > { %v2406_v60 = vsub.f32 %v553_v32, %v593_v57  ;;  %v2408_v61 = vsub.f32 %v554_v33, %v593_v57 }
  0xe0   : > { %v2410_v62 = vsub.f32 %v557_v34, %v595_v59  ;;  %v2412_v63 = vsub.f32 %v558_v36, %v595_v59  ;;  %v574_v0 = vpop.xlane.xlu0 %573 }
  0xe1   : > { %v594_v1 = vmul.f32 0.00390625, %v574_v0  ;;  %v580_v2 = vpop.xlane.xlu1 %579  ;;  %v617_v3 = vmul.f32 %v2406_v60, %v2406_v60  ;;  %v618_v4 = vmul.f32 %v2408_v61, %v2408_v61 }
  0xe2   : > { %v596_v5 = vmul.f32 0.00390625, %v580_v2  ;;  %v621_v6 = vmul.f32 %v2410_v62, %v2410_v62  ;;  %v622_v7 = vmul.f32 %v2412_v63, %v2412_v63 }
  0xe3   : > { %v2422_v8 = vsub.f32 %v555_v37, %v594_v1  ;;  %v2424_v9 = vsub.f32 %v556_v38, %v594_v1  ;;  %v633_v10 = vadd.f32 %v618_v4, %v617_v3 }
  0xe4   : > { %v2426_v11 = vsub.f32 %v559_v40, %v596_v5  ;;  %v2428_v12 = vsub.f32 %v560_v41, %v596_v5  ;;  %v583_v13 = vpop.xlane.xlu0 %582  ;;  %v639_v16 = vadd.f32 %v622_v7, %v621_v6 }
  0xe5   : > { %v597_v14 = vmul.f32 0.00390625, %v583_v13  ;;  %634 = vadd.xlane.f32.xlu0 %v633_v10  ;;  %v586_v15 = vpop.xlane.xlu1 %585  ;;  %v619_v17 = vmul.f32 %v2422_v8, %v2422_v8  ;;  %v620_v18 = vmul.f32 %v2424_v9, %v2424_v9  ;;  %v697_v10 = vld [vmem:[%s2778_s1] sm:$0x3] }
  0xe6   : > { %v598_v19 = vmul.f32 0.00390625, %v586_v15  ;;  %v623_v20 = vmul.f32 %v2426_v11, %v2426_v11  ;;  %v624_v21 = vmul.f32 %v2428_v12, %v2428_v12 }
  0xe7   : > { %v2438_v22 = vsub.f32 %v561_v44, %v597_v14  ;;  %v2440_v23 = vsub.f32 %v562_v45, %v597_v14  ;;  %v636_v24 = vadd.f32 %v620_v18, %v619_v17 }
  0xe8   : > { %v2442_v25 = vsub.f32 %v563_v46, %v598_v19  ;;  %v2444_v26 = vsub.f32 %v564_v47, %v598_v19  ;;  %v589_v27 = vpop.xlane.xlu0 %588  ;;  %v642_v30 = vadd.f32 %v624_v21, %v623_v20  ;;  %v725_v20 = vld [vmem:[%s2779_s2] sm:$0x3] }
  0xe9   : > { %v599_v28 = vmul.f32 0.00390625, %v589_v27  ;;  %640 = vadd.xlane.f32.xlu0 %v639_v16  ;;  %637 = vadd.xlane.f32.xlu1 %v636_v24  ;;  %v592_v29 = vpop.xlane.xlu1 %591  ;;  %v625_v31 = vmul.f32 %v2438_v22, %v2438_v22  ;;  %v626_v32 = vmul.f32 %v2440_v23, %v2440_v23 }
  0xea   : > { %v600_v33 = vmul.f32 0.00390625, %v592_v29  ;;  %v627_v34 = vmul.f32 %v2442_v25, %v2442_v25  ;;  %v628_v35 = vmul.f32 %v2444_v26, %v2444_v26 }
  0xeb   : > { %v2454_v36 = vsub.f32 %v565_v50, %v599_v28  ;;  %v2456_v37 = vsub.f32 %v566_v51, %v599_v28  ;;  %v645_v38 = vadd.f32 %v626_v32, %v625_v31  ;;  %v699_v51 = vlaneseq }
  0xec   : > { %v2458_v39 = vsub.f32 %v567_v52, %v600_v33  ;;  %v2460_v40 = vsub.f32 %v568_v53, %v600_v33  ;;  %v648_v41 = vadd.f32 %v628_v35, %v627_v34 }
  0xed   : > { %643 = vadd.xlane.f32.xlu1 %v642_v30  ;;  %646 = vadd.xlane.f32.xlu0 %v645_v38  ;;  %v629_v42 = vmul.f32 %v2454_v36, %v2454_v36  ;;  %v630_v43 = vmul.f32 %v2456_v37, %v2456_v37  ;;  %v700_v57 = vshrl.u32 %v699_v51, 7 }
  0xee   : > { %v631_v44 = vmul.f32 %v2458_v39, %v2458_v39  ;;  %v632_v45 = vmul.f32 %v2460_v40, %v2460_v40 }
  0xef   : > { %v651_v46 = vadd.f32 %v630_v43, %v629_v42  ;;  %v701_v4 = vsub.s32 0, %v700_v57  ;;  %v705_v5 = vsub.s32 1, %v700_v57 }
  0xf0   : > { %v654_v47 = vadd.f32 %v632_v45, %v631_v44 }
  0xf1   : > { %649 = vadd.xlane.f32.xlu1 %v648_v41  ;;  %652 = vadd.xlane.f32.xlu0 %v651_v46  ;;  %v2473_v18 = vrot.slane %v697_v10, %v701_v4  ;;  %v2475_v19 = vrot.slane %v697_v10, %v705_v5  ;;  %v2482_v31 = vrot.slane %v725_v20, %v701_v4 }
  0xf2   : > { %v2484_v33 = vrot.slane %v725_v20, %v705_v5 }
  0xf5   : > { %655 = vadd.xlane.f32.xlu1 %v654_v47 }
 0x172   : > { %v635_v49 = vpop.xlane.xlu0 %634 }
 0x173   : > { %v657_v50 = vmul.f32 0.00390625, %v635_v49 }
 0x175   : > { %v665_v52 = vadd.f32 1e-06, %v657_v50 }
 0x176   : > { %v638_v53 = vpop.xlane.xlu1 %637  ;;  %v641_v54 = vpop.xlane.xlu0 %640 }
 0x177   : > { %1890 = vrsqrt.f32 %v665_v52  ;;  %v658_v55 = vmul.f32 0.00390625, %v638_v53  ;;  %v659_v56 = vmul.f32 0.00390625, %v641_v54 }
 0x179   : > { %v666_v58 = vadd.f32 1e-06, %v658_v55  ;;  %v667_v59 = vadd.f32 1e-06, %v659_v56 }
 0x17a   : > { %v644_v0 = vpop.xlane.xlu1 %643  ;;  %v647_v1 = vpop.xlane.xlu0 %646 }
 0x17b   : > { %1892 = vrsqrt.f32 %v666_v58  ;;  %v660_v2 = vmul.f32 0.00390625, %v644_v0  ;;  %v661_v3 = vmul.f32 0.00390625, %v647_v1 }
 0x17c   : > { %1894 = vrsqrt.f32 %v667_v59 }
 0x17d   : > { %v668_v6 = vadd.f32 1e-06, %v660_v2  ;;  %v669_v7 = vadd.f32 1e-06, %v661_v3 }
 0x17e   : > { %v650_v13 = vpop.xlane.xlu1 %649  ;;  %v653_v14 = vpop.xlane.xlu0 %652 }
 0x17f   : > { %1896 = vrsqrt.f32 %v668_v6  ;;  %v662_v15 = vmul.f32 0.00390625, %v650_v13  ;;  %v663_v16 = vmul.f32 0.00390625, %v653_v14 }
 0x180   : > { %1898 = vrsqrt.f32 %v669_v7 }
 0x181   : > { %v1891_v17 = vpop.eup %1890  ;;  %v670_v21 = vadd.f32 1e-06, %v662_v15  ;;  %v671_v24 = vadd.f32 1e-06, %v663_v16 }
 0x182   : > { %v681_v27 = vmul.f32 %v1891_v17, %v2406_v60  ;;  %v682_v28 = vmul.f32 %v1891_v17, %v2408_v61  ;;  %v656_v29 = vpop.xlane.xlu1 %655 }
 0x183   : > { %1900 = vrsqrt.f32 %v670_v21  ;;  %v664_v30 = vmul.f32 0.00390625, %v656_v29 }
 0x184   : > { %1902 = vrsqrt.f32 %v671_v24  ;;  %v709_v34 = vmul.f32 %v2473_v18, %v681_v27  ;;  %v710_v35 = vmul.f32 %v2475_v19, %v682_v28 }
 0x185   : > { %v1893_v32 = vpop.eup %1892  ;;  %v672_v38 = vadd.f32 1e-06, %v664_v30 }
 0x186   : > { %v1895_v41 = vpop.eup %1894  ;;  %v683_v42 = vmul.f32 %v1893_v32, %v2422_v8  ;;  %v684_v60 = vmul.f32 %v1893_v32, %v2424_v9  ;;  %v737_v47 = vadd.f32 %v2482_v31, %v709_v34  ;;  %v738_v48 = vadd.f32 %v2484_v33, %v710_v35 }
 0x187   : > { %v685_v61 = vmul.f32 %v1895_v41, %v2410_v62  ;;  %v686_v43 = vmul.f32 %v1895_v41, %v2412_v63  ;;  %1904 = vrsqrt.f32 %v672_v38 }
 0x188   : > { %v711_v44 = vmul.f32 %v2473_v18, %v683_v42  ;;  %v712_v45 = vmul.f32 %v2475_v19, %v684_v60 }
 0x189   : > { %v1897_v46 = vpop.eup %1896  ;;  %v713_v49 = vmul.f32 %v2473_v18, %v685_v61  ;;  %v714_v8 = vmul.f32 %v2475_v19, %v686_v43 }
 0x18a   : > { %v1899_v50 = vpop.eup %1898  ;;  %v739_v9 = vadd.f32 %v2482_v31, %v711_v44  ;;  %v740_v62 = vadd.f32 %v2484_v33, %v712_v45  ;;  %v687_v63 = vmul.f32 %v1897_v46, %v2426_v11  ;;  %v688_v51 = vmul.f32 %v1897_v46, %v2428_v12 }
 0x18b   : > { %v689_v52 = vmul.f32 %v1899_v50, %v2438_v22  ;;  %v690_v53 = vmul.f32 %v1899_v50, %v2440_v23  ;;  %v741_v59 = vadd.f32 %v2482_v31, %v713_v49  ;;  %v742_v0 = vadd.f32 %v2484_v33, %v714_v8 }
 0x18c   : > { %v753_v54 = vpack.c.bf16 %v739_v9, %v737_v47  ;;  %v754_v55 = vpack.c.bf16 %v740_v62, %v738_v48  ;;  %v715_v56 = vmul.f32 %v2473_v18, %v687_v63  ;;  %v716_v57 = vmul.f32 %v2475_v19, %v688_v51 }
 0x18d   : > { %v1901_v58 = vpop.eup %1900  ;;  %v717_v1 = vmul.f32 %v2473_v18, %v689_v52  ;;  %v718_v11 = vmul.f32 %v2475_v19, %v690_v53 }
 0x18e   : > { %v1903_v12 = vpop.eup %1902  ;;  %761 = vst [vmem:[#allocation2] sm:$0xff] %v753_v54  ;;  %762 = vst [vmem:[#allocation2 + $0x8] sm:$0xff] %v754_v55  ;;  %v743_v22 = vadd.f32 %v2482_v31, %v715_v56  ;;  %v744_v23 = vadd.f32 %v2484_v33, %v716_v57  ;;  %v691_v2 = vmul.f32 %v1901_v58, %v2442_v25 }
 0x18f   : > { %v692_v3 = vmul.f32 %v1901_v58, %v2444_v26  ;;  %v693_v4 = vmul.f32 %v1903_v12, %v2454_v36  ;;  %v694_v5 = vmul.f32 %v1903_v12, %v2456_v37  ;;  %v745_v15 = vadd.f32 %v2482_v31, %v717_v1 }
 0x190   : > { %v755_v6 = vpack.c.bf16 %v743_v22, %v741_v59  ;;  %v756_v7 = vpack.c.bf16 %v744_v23, %v742_v0  ;;  %v719_v10 = vmul.f32 %v2473_v18, %v691_v2  ;;  %v746_v16 = vadd.f32 %v2484_v33, %v718_v11 }
 0x191   : > { %v720_v13 = vmul.f32 %v2475_v19, %v692_v3  ;;  %v1905_v14 = vpop.eup %1904  ;;  %v721_v17 = vmul.f32 %v2473_v18, %v693_v4  ;;  %v722_v25 = vmul.f32 %v2475_v19, %v694_v5 }
 0x192   : > { %763 = vst [vmem:[#allocation2 + $0x10] sm:$0xff] %v755_v6  ;;  %764 = vst [vmem:[#allocation2 + $0x18] sm:$0xff] %v756_v7  ;;  %v747_v26 = vadd.f32 %v2482_v31, %v719_v10  ;;  %v695_v37 = vmul.f32 %v1905_v14, %v2458_v39  ;;  %v696_v20 = vmul.f32 %v1905_v14, %v2460_v40 }
 0x193   : > { %v748_v36 = vadd.f32 %v2484_v33, %v720_v13  ;;  %v749_v29 = vadd.f32 %v2482_v31, %v721_v17  ;;  %v750_v30 = vadd.f32 %v2484_v33, %v722_v25 }
 0x194   : > { %v757_v21 = vpack.c.bf16 %v747_v26, %v745_v15  ;;  %v723_v27 = vmul.f32 %v2473_v18, %v695_v37  ;;  %v724_v28 = vmul.f32 %v2475_v19, %v696_v20 }
 0x195   : > { %v758_v24 = vpack.c.bf16 %v748_v36, %v746_v16 }
 0x196   : > { %765 = vst [vmem:[#allocation2 + $0x20] sm:$0xff] %v757_v21  ;;  %v751_v32 = vadd.f32 %v2482_v31, %v723_v27  ;;  %v752_v34 = vadd.f32 %v2484_v33, %v724_v28 }
 0x197   : > { %766 = vst [vmem:[#allocation2 + $0x28] sm:$0xff] %v758_v24 }
 0x198   : > { %v759_v35 = vpack.c.bf16 %v751_v32, %v749_v29  ;;  %v760_v39 = vpack.c.bf16 %v752_v34, %v750_v30 }
 0x19a   : > { %767 = vst [vmem:[#allocation2 + $0x30] sm:$0xff] %v759_v35  ;;  %768 = vst [vmem:[#allocation2 + $0x38] sm:$0xff] %v760_v39 }
 0x19b PF: > { %v1906_v40 = vld [vmem:[%s2385_s23 + $0x4] ss:$8 sps:$4 sm:$0xff]   ;;  %v1908_v18 = vld [vmem:[%s2385_s23] ss:$8 sps:$4 sm:$0xff]   ;;  %v1909_v19 = vld [vmem:[%s2385_s23 + $0x14] ss:$8 sps:$4 sm:$0xff]  }
 0x19c   : > { %997 = vmatprep.subr.bf16.mxu0 %v1906_v40  ;;  %v1911_v31 = vld [vmem:[%s2385_s23 + $0x10] ss:$8 sps:$4 sm:$0xff]   ;;  %v1912_v33 = vld [vmem:[%s2385_s23 + $0x24] ss:$8 sps:$4 sm:$0xff]   ;;  %v1914_v38 = vld [vmem:[%s2385_s23 + $0x20] ss:$8 sps:$4 sm:$0xff]  }
 0x19d   : > { %998 = vmatpush1.bf16.msra.mxu0 %v1908_v18  ;;  %v1915_v41 = vld [vmem:[%s2385_s23 + $0x34] ss:$8 sps:$4 sm:$0xff]   ;;  %v1917_v42 = vld [vmem:[%s2385_s23 + $0x30] ss:$8 sps:$4 sm:$0xff]   ;;  %v1918_v60 = vld [vmem:[%s2385_s23 + $0x44] ss:$8 sps:$4 sm:$0xff]  }
 0x19e   : > { %999 = vmatprep.subr.bf16.mxu0 %v1909_v19  ;;  %v1920_v61 = vld [vmem:[%s2385_s23 + $0x40] ss:$8 sps:$4 sm:$0xff]   ;;  %v1921_v43 = vld [vmem:[%s2385_s23 + $0x54] ss:$8 sps:$4 sm:$0xff]   ;;  %v1923_v44 = vld [vmem:[%s2385_s23 + $0x50] ss:$8 sps:$4 sm:$0xff]  }
 0x19f   : > { %v1924_v45 = vld [vmem:[%s2385_s23 + $0x64] ss:$8 sps:$4 sm:$0xff]   ;;  %v1926_v47 = vld [vmem:[%s2385_s23 + $0x60] ss:$8 sps:$4 sm:$0xff]   ;;  %v1927_v48 = vld [vmem:[%s2385_s23 + $0x74] ss:$8 sps:$4 sm:$0xff]  }
 0x1a0   : > { %v786_v46 = vld [vmem:[#allocation2 + $0x8] sm:$0xff]  ;;  %v1929_v50 = vld [vmem:[%s2385_s23 + $0x70] ss:$8 sps:$4 sm:$0xff]   ;;  %v1957_v9 = vld [vmem:[%s2383_s26 + $0x14] ss:$8 sps:$4 sm:$0xff]   ;;  %p1783_p7 = scmp.ne.s32.totalorder %s2128_s29, 1 }
 0x1a1   : > { %1000 = vmatpush1.bf16.msra.mxu0 %v1911_v31  ;;  %1029 = vmatprep.mubr.bf16.mxu0 %v786_v46  ;;  %v1954_v49 = vld [vmem:[%s2383_s26 + $0x4] ss:$8 sps:$4 sm:$0xff]   ;;  %v1956_v8 = vld [vmem:[%s2383_s26] ss:$8 sps:$4 sm:$0xff]   ;;  %v1959_v63 = vld [vmem:[%s2383_s26 + $0x10] ss:$8 sps:$4 sm:$0xff]  }
 0x1a2   : > { %1001 = vmatprep.subr.bf16.mxu0 %v1912_v33  ;;  %1366 = vmatprep.subr.bf16.mxu1 %v1954_v49  ;;  %v1930_v62 = vld [vmem:[%s2385_s23 + $0x84] ss:$8 sps:$4 sm:$0xff]   ;;  %v1932_v52 = vld [vmem:[%s2385_s23 + $0x80] ss:$8 sps:$4 sm:$0xff]   ;;  %v1933_v53 = vld [vmem:[%s2385_s23 + $0x94] ss:$8 sps:$4 sm:$0xff]  }
 0x1a3   : > { %1367 = vmatpush1.bf16.msra.mxu1 %v1956_v8  ;;  %v1960_v51 = vld [vmem:[%s2383_s26 + $0x24] ss:$8 sps:$4 sm:$0xff]   ;;  %v1962_v54 = vld [vmem:[%s2383_s26 + $0x20] ss:$8 sps:$4 sm:$0xff]   ;;  %v1963_v55 = vld [vmem:[%s2383_s26 + $0x34] ss:$8 sps:$4 sm:$0xff]  }
 0x1a4   : > { %1368 = vmatprep.subr.bf16.mxu1 %v1957_v9  ;;  %v1935_v56 = vld [vmem:[%s2385_s23 + $0x90] ss:$8 sps:$4 sm:$0xff]   ;;  %v1936_v57 = vld [vmem:[%s2385_s23 + $0xa4] ss:$8 sps:$4 sm:$0xff]   ;;  %v1938_v0 = vld [vmem:[%s2385_s23 + $0xa0] ss:$8 sps:$4 sm:$0xff]  }
 0x1a5   : > { %1002 = vmatpush1.bf16.msra.mxu0 %v1914_v38  ;;  %v1965_v58 = vld [vmem:[%s2383_s26 + $0x30] ss:$8 sps:$4 sm:$0xff]   ;;  %v1966_v59 = vld [vmem:[%s2383_s26 + $0x44] ss:$8 sps:$4 sm:$0xff]   ;;  %v1968_v1 = vld [vmem:[%s2383_s26 + $0x40] ss:$8 sps:$4 sm:$0xff]  }
 0x1a6   : > { %1003 = vmatprep.subr.bf16.mxu0 %v1915_v41  ;;  %v1939_v11 = vld [vmem:[%s2385_s23 + $0xb4] ss:$8 sps:$4 sm:$0xff]   ;;  %v1941_v22 = vld [vmem:[%s2385_s23 + $0xb0] ss:$8 sps:$4 sm:$0xff]   ;;  %v1942_v2 = vld [vmem:[%s2385_s23 + $0xc4] ss:$8 sps:$4 sm:$0xff]  }
 0x1a7   : > { %1369 = vmatpush1.bf16.msra.mxu1 %v1959_v63  ;;  %v1969_v12 = vld [vmem:[%s2383_s26 + $0x54] ss:$8 sps:$4 sm:$0xff]   ;;  %v1971_v23 = vld [vmem:[%s2383_s26 + $0x50] ss:$8 sps:$4 sm:$0xff]   ;;  %v1972_v3 = vld [vmem:[%s2383_s26 + $0x64] ss:$8 sps:$4 sm:$0xff]  }
 0x1a8   : > { %1370 = vmatprep.subr.bf16.mxu1 %v1960_v51  ;;  %v1944_v4 = vld [vmem:[%s2385_s23 + $0xc0] ss:$8 sps:$4 sm:$0xff]   ;;  %v1945_v6 = vld [vmem:[%s2385_s23 + $0xd4] ss:$8 sps:$4 sm:$0xff]   ;;  %v1947_v10 = vld [vmem:[%s2385_s23 + $0xd0] ss:$8 sps:$4 sm:$0xff]  }
 0x1a9   : > { %1004 = vmatpush1.bf16.msra.mxu0 %v1917_v42  ;;  %v1974_v5 = vld [vmem:[%s2383_s26 + $0x60] ss:$8 sps:$4 sm:$0xff]   ;;  %v1975_v7 = vld [vmem:[%s2383_s26 + $0x74] ss:$8 sps:$4 sm:$0xff]   ;;  %v1977_v13 = vld [vmem:[%s2383_s26 + $0x70] ss:$8 sps:$4 sm:$0xff]  }
 0x1aa   : > { %1005 = vmatprep.subr.bf16.mxu0 %v1918_v60  ;;  %v1948_v14 = vld [vmem:[%s2385_s23 + $0xe4] ss:$8 sps:$4 sm:$0xff]   ;;  %v1950_v16 = vld [vmem:[%s2385_s23 + $0xe0] ss:$8 sps:$4 sm:$0xff]   ;;  %v1951_v25 = vld [vmem:[%s2385_s23 + $0xf4] ss:$8 sps:$4 sm:$0xff]   ;;  %v827_v60 = vlaneseq }
 0x1ab   : > { %1371 = vmatpush1.bf16.msra.mxu1 %v1962_v54  ;;  %v1978_v15 = vld [vmem:[%s2383_s26 + $0x84] ss:$8 sps:$4 sm:$0xff]   ;;  %v1980_v17 = vld [vmem:[%s2383_s26 + $0x80] ss:$8 sps:$4 sm:$0xff]   ;;  %v1981_v26 = vld [vmem:[%s2383_s26 + $0x94] ss:$8 sps:$4 sm:$0xff]  }
 0x1ac   : > { %1372 = vmatprep.subr.bf16.mxu1 %v1963_v55  ;;  %v1953_v36 = vld [vmem:[%s2385_s23 + $0xf0] ss:$8 sps:$4 sm:$0xff]   ;;  %v785_v20 = vld [vmem:[#allocation2] sm:$0xff]  ;;  %v790_v27 = vld [vmem:[#allocation2 + $0x28] sm:$0xff] }
 0x1ad   : > { %1006 = vmatpush1.bf16.msra.mxu0 %v1920_v61  ;;  %v1983_v37 = vld [vmem:[%s2383_s26 + $0x90] ss:$8 sps:$4 sm:$0xff]   ;;  %v789_v28 = vld [vmem:[#allocation2 + $0x20] sm:$0xff]  ;;  %v1987_v35 = vld [vmem:[%s2383_s26 + $0xb4] ss:$8 sps:$4 sm:$0xff]   ;;  %v2596_v61 = vshrl.u32 %v827_v60, 7 }
 0x1ae   : > { %1007 = vmatprep.subr.bf16.mxu0 %v1921_v43  ;;  %v788_v21 = vld [vmem:[#allocation2 + $0x18] sm:$0xff]  ;;  %v787_v24 = vld [vmem:[#allocation2 + $0x10] sm:$0xff]  ;;  %v1984_v32 = vld [vmem:[%s2383_s26 + $0xa4] ss:$8 sps:$4 sm:$0xff]  }
 0x1af   : > { %1373 = vmatpush1.bf16.msra.mxu1 %v1965_v58  ;;  %v792_v29 = vld [vmem:[#allocation2 + $0x38] sm:$0xff]  ;;  %v791_v30 = vld [vmem:[#allocation2 + $0x30] sm:$0xff]  ;;  %v1986_v34 = vld [vmem:[%s2383_s26 + $0xa0] ss:$8 sps:$4 sm:$0xff]   ;;  %v829_v43 = vsub.s32 0, %v2596_v61 }
 0x1b0   : > { %1374 = vmatprep.subr.bf16.mxu1 %v1966_v59  ;;  %v1989_v39 = vld [vmem:[%s2383_s26 + $0xb0] ss:$8 sps:$4 sm:$0xff]   ;;  %v1990_v40 = vld [vmem:[%s2383_s26 + $0xc4] ss:$8 sps:$4 sm:$0xff]   ;;  %v1992_v18 = vld [vmem:[%s2383_s26 + $0xc0] ss:$8 sps:$4 sm:$0xff]  }
 0x1b1   : > { %1008 = vmatpush1.bf16.msra.mxu0 %v1923_v44  ;;  %v1993_v19 = vld [vmem:[%s2383_s26 + $0xd4] ss:$8 sps:$4 sm:$0xff]   ;;  %v1995_v31 = vld [vmem:[%s2383_s26 + $0xd0] ss:$8 sps:$4 sm:$0xff]   ;;  %v1996_v33 = vld [vmem:[%s2383_s26 + $0xe4] ss:$8 sps:$4 sm:$0xff]  }
 0x1b2   : > { %1009 = vmatprep.subr.bf16.mxu0 %v1924_v45  ;;  %v1998_v38 = vld [vmem:[%s2383_s26 + $0xe0] ss:$8 sps:$4 sm:$0xff]   ;;  %v1999_v41 = vld [vmem:[%s2383_s26 + $0xf4] ss:$8 sps:$4 sm:$0xff]   ;;  %v2001_v42 = vld [vmem:[%s2383_s26 + $0xf0] ss:$8 sps:$4 sm:$0xff]  }
 0x1b3   : > { %1375 = vmatpush1.bf16.msra.mxu1 %v1968_v1  ;;  %v825_v44 = vld [vmem:[%s534_s8] sm:$0x3]  ;;  %v833_v45 = vsub.s32 1, %v2596_v61 }
 0x1b4   : > { %1376 = vmatprep.subr.bf16.mxu1 %v1969_v12  ;;  %v2607_v46 = vrot.slane %v825_v44, %v829_v43  ;;  %v1523_v61 = vld [vmem:[%s2374_s14 + $0x20] sm:$0xff] (!%p1783_p7) }
 0x1b5   : > { %1010 = vmatpush1.bf16.msra.mxu0 %v1926_v47  ;;  %v2611_v47 = vrot.slane %v825_v44, %v833_v45 }
 0x1b6   : > { %1011 = vmatprep.subr.bf16.mxu0 %v1927_v48 }
 0x1b7   : > { %1377 = vmatpush1.bf16.msra.mxu1 %v1971_v23 }
 0x1b8   : > { %1378 = vmatprep.subr.bf16.mxu1 %v1972_v3 }
 0x1b9   : > { %1012 = vmatpush1.bf16.msra.mxu0 %v1929_v50 }
 0x1ba   : > { %1013 = vmatprep.subr.bf16.mxu0 %v1930_v62 }
 0x1bb   : > { %1379 = vmatpush1.bf16.msra.mxu1 %v1974_v5 }
 0x1bc   : > { %1380 = vmatprep.subr.bf16.mxu1 %v1975_v7 }
 0x1bd   : > { %1014 = vmatpush1.bf16.msra.mxu0 %v1932_v52 }
 0x1be   : > { %1015 = vmatprep.subr.bf16.mxu0 %v1933_v53 }
 0x1bf   : > { %1381 = vmatpush1.bf16.msra.mxu1 %v1977_v13 }
 0x1c0   : > { %1382 = vmatprep.subr.bf16.mxu1 %v1978_v15 }
 0x1c1   : > { %1016 = vmatpush1.bf16.msra.mxu0 %v1935_v56 }
 0x1c2   : > { %1017 = vmatprep.subr.bf16.mxu0 %v1936_v57 }
 0x1c3   : > { %1383 = vmatpush1.bf16.msra.mxu1 %v1980_v17 }
 0x1c4   : > { %1384 = vmatprep.subr.bf16.mxu1 %v1981_v26 }
 0x1c5   : > { %1018 = vmatpush1.bf16.msra.mxu0 %v1938_v0 }
 0x1c6   : > { %1019 = vmatprep.subr.bf16.mxu0 %v1939_v11 }
 0x1c7   : > { %1385 = vmatpush1.bf16.msra.mxu1 %v1983_v37 }
 0x1c8   : > { %1386 = vmatprep.subr.bf16.mxu1 %v1984_v32 }
 0x1c9   : > { %1020 = vmatpush1.bf16.msra.mxu0 %v1941_v22 }
 0x1ca   : > { %1021 = vmatprep.subr.bf16.mxu0 %v1942_v2 }
 0x1cb   : > { %1387 = vmatpush1.bf16.msra.mxu1 %v1986_v34 }
 0x1cc   : > { %1388 = vmatprep.subr.bf16.mxu1 %v1987_v35 }
 0x1cd   : > { %1022 = vmatpush1.bf16.msra.mxu0 %v1944_v4 }
 0x1ce   : > { %1023 = vmatprep.subr.bf16.mxu0 %v1945_v6 }
 0x1cf   : > { %1389 = vmatpush1.bf16.msra.mxu1 %v1989_v39 }
 0x1d0   : > { %1390 = vmatprep.subr.bf16.mxu1 %v1990_v40 }
 0x1d1   : > { %1024 = vmatpush1.bf16.msra.mxu0 %v1947_v10 }
 0x1d2   : > { %1025 = vmatprep.subr.bf16.mxu0 %v1948_v14 }
 0x1d3   : > { %1391 = vmatpush1.bf16.msra.mxu1 %v1992_v18 }
 0x1d4   : > { %1392 = vmatprep.subr.bf16.mxu1 %v1993_v19 }
 0x1d5   : > { %1026 = vmatpush1.bf16.msra.mxu0 %v1950_v16 }
 0x1d6   : > { %1027 = vmatprep.subr.bf16.mxu0 %v1951_v25 }
 0x1d7   : > { %1393 = vmatpush1.bf16.msra.mxu1 %v1995_v31 }
 0x1d8   : > { %1394 = vmatprep.subr.bf16.mxu1 %v1996_v33 }
 0x1d9   : > { %1028 = vmatpush1.bf16.msra.mxu0 %v1953_v36 }
 0x1db   : > { %1395 = vmatpush1.bf16.msra.mxu1 %v1998_v38 }
 0x1dc   : > { %1030 = vmatmul.mubr.bf16.vlgmr.msra.gmra.mrb[0].mxu0 %v785_v20  ;;  %1396 = vmatprep.subr.bf16.mxu1 %v1999_v41 }
 0x1dd   : > { %1039 = vmatprep.mubr.bf16.mxu0 %v788_v21 }
 0x1df   : > { %1397 = vmatpush1.bf16.msra.mxu1 %v2001_v42 }
 0x1e4   : > { %1040 = vmatmul.mubr.bf16.gmra.mrb[4].mxu0 %v787_v24 }
 0x1e5   : > { %1049 = vmatprep.mubr.bf16.mxu0 %v790_v27 }
 0x1ec   : > { %1050 = vmatmul.mubr.bf16.gmra.mrb[8].mxu0 %v789_v28 }
 0x1ed   : > { %1059 = vmatprep.mubr.bf16.mxu0 %v792_v29 }
 0x1f4   : > { %1060 = vmatmul.mubr.bf16.gmra.mrb[12].mxu0 %v791_v30 }
 0x2af   : > { %v1031_v48 = vpop.f32.mrb[0].mxu0 }
 0x2b0   : > { %v1032_v49 = vadd.f32 %v1031_v48, %v2607_v46  ;;  %v1033_v8 = vpop.f32.mrb[1].mxu0 }
 0x2b1   : > { %v1034_v50 = vadd.f32 %v1033_v8, %v2611_v47  ;;  %v1035_v9 = vpop.f32.mrb[2].mxu0 }
 0x2b2   : > { %v1086_v62 = vmul.f32 0.70710677, %v1032_v49  ;;  %v1036_v63 = vadd.f32 %v1035_v9, %v2607_v46  ;;  %v1037_v51 = vpop.f32.mrb[3].mxu0  ;;  %v1070_v10 = vmul.f32 0.5, %v1032_v49 }
 0x2b3   : > { %v1087_v52 = vmul.f32 0.70710677, %v1034_v50  ;;  %v1038_v53 = vadd.f32 %v1037_v51, %v2611_v47  ;;  %v1071_v20 = vmul.f32 0.5, %v1034_v50 }
 0x2b4   : > { %2002 = verf.f32 %v1086_v62  ;;  %v1088_v54 = vmul.f32 0.70710677, %v1036_v63  ;;  %v1072_v17 = vmul.f32 0.5, %v1036_v63 }
 0x2b5   : > { %2004 = verf.f32 %v1087_v52  ;;  %v1089_v55 = vmul.f32 0.70710677, %v1038_v53  ;;  %v1073_v30 = vmul.f32 0.5, %v1038_v53 }
 0x2b6   : > { %2006 = verf.f32 %v1088_v54 }
 0x2b7   : > { %2008 = verf.f32 %v1089_v55  ;;  %v1041_v56 = vpop.f32.mrb[4].mxu0 }
 0x2b8   : > { %v1042_v57 = vadd.f32 %v1041_v56, %v2607_v46  ;;  %v1043_v58 = vpop.f32.mrb[5].mxu0 }
 0x2b9   : > { %v1044_v59 = vadd.f32 %v1043_v58, %v2611_v47  ;;  %v1045_v0 = vpop.f32.mrb[6].mxu0 }
 0x2ba   : > { %v1090_v1 = vmul.f32 0.70710677, %v1042_v57  ;;  %v1046_v11 = vadd.f32 %v1045_v0, %v2607_v46  ;;  %v1047_v12 = vpop.f32.mrb[7].mxu0  ;;  %v1074_v9 = vmul.f32 0.5, %v1042_v57 }
 0x2bb   : > { %v1091_v22 = vmul.f32 0.70710677, %v1044_v59  ;;  %v1048_v23 = vadd.f32 %v1047_v12, %v2611_v47  ;;  %v1075_v53 = vmul.f32 0.5, %v1044_v59 }
 0x2bc   : > { %2010 = verf.f32 %v1090_v1  ;;  %v1092_v2 = vmul.f32 0.70710677, %v1046_v11  ;;  %v1076_v62 = vmul.f32 0.5, %v1046_v11 }
 0x2bd   : > { %2012 = verf.f32 %v1091_v22  ;;  %v1093_v3 = vmul.f32 0.70710677, %v1048_v23  ;;  %v1077_v54 = vmul.f32 0.5, %v1048_v23 }
 0x2be   : > { %v2003_v4 = vpop.eup %2002  ;;  %2014 = verf.f32 %v1092_v2 }
 0x2bf   : > { %v2005_v5 = vpop.eup %2004  ;;  %2016 = verf.f32 %v1093_v3  ;;  %v1051_v6 = vpop.f32.mrb[8].mxu0  ;;  %v1118_v13 = vadd.f32 1.0, %v2003_v4 }
 0x2c0   : > { %v2007_v7 = vpop.eup %2006  ;;  %v2622_v14 = vadd.f32 %v1051_v6, %v2607_v46  ;;  %v1053_v15 = vpop.f32.mrb[9].mxu0  ;;  %v1119_v37 = vadd.f32 1.0, %v2005_v5 }
 0x2c1   : > { %v2009_v16 = vpop.eup %2008  ;;  %v1120_v25 = vadd.f32 1.0, %v2007_v7  ;;  %v2625_v26 = vadd.f32 %v1053_v15, %v2611_v47  ;;  %v1055_v36 = vpop.f32.mrb[10].mxu0  ;;  %v1134_v35 = vmul.f32 %v1118_v13, %v1070_v10 }
 0x2c2   : > { %v1094_v21 = vmul.f32 0.70710677, %v2622_v14  ;;  %v1056_v24 = vadd.f32 %v1055_v36, %v2607_v46  ;;  %v1057_v27 = vpop.f32.mrb[11].mxu0  ;;  %v1121_v28 = vadd.f32 1.0, %v2009_v16  ;;  %v1135_v18 = vmul.f32 %v1119_v37, %v1071_v20 }
 0x2c3   : > { %v1136_v29 = vmul.f32 %v1120_v25, %v1072_v17  ;;  %v1095_v32 = vmul.f32 0.70710677, %v2625_v26  ;;  %v1058_v34 = vadd.f32 %v1057_v27, %v2611_v47 }
 0x2c4   : > { %2018 = verf.f32 %v1094_v21  ;;  %v1096_v39 = vmul.f32 0.70710677, %v1056_v24  ;;  %v1137_v19 = vmul.f32 %v1121_v28, %v1073_v30  ;;  %v1080_v16 = vmul.f32 0.5, %v1056_v24 }
 0x2c5   : > { %2020 = verf.f32 %v1095_v32  ;;  %v1097_v40 = vmul.f32 0.70710677, %v1058_v34  ;;  %v1166_v33 = vpack.c.bf16 %v1136_v29, %v1134_v35  ;;  %v1081_v25 = vmul.f32 0.5, %v1058_v34 }
 0x2c6   : > { %v2011_v31 = vpop.eup %2010  ;;  %2022 = verf.f32 %v1096_v39  ;;  %v1167_v60 = vpack.c.bf16 %v1137_v19, %v1135_v18 }
 0x2c7   : > { %v2013_v38 = vpop.eup %2012  ;;  %v1122_v41 = vadd.f32 1.0, %v2011_v31  ;;  %2024 = verf.f32 %v1097_v40  ;;  %v1061_v42 = vpop.f32.mrb[12].mxu0 }
 0x2c8   : > { %v2015_v44 = vpop.eup %2014  ;;  %v1123_v48 = vadd.f32 1.0, %v2013_v38  ;;  %v1062_v49 = vadd.f32 %v1061_v42, %v2607_v46  ;;  %v1063_v8 = vpop.f32.mrb[13].mxu0  ;;  %1398 = vmatprep.mubr.bf16.mxu1 %v1167_v60 }
 0x2c9   : > { %v2017_v50 = vpop.eup %2016  ;;  %v1124_v63 = vadd.f32 1.0, %v2015_v44  ;;  %v1064_v51 = vadd.f32 %v1063_v8, %v2611_v47  ;;  %v1065_v52 = vpop.f32.mrb[14].mxu0  ;;  %1399 = vmatmul.mubr.bf16.vlgmr.msra.gmra.mrb[0].mxu1 %v1166_v33  ;;  %v1138_v0 = vmul.f32 %v1122_v41, %v1074_v9  ;;  %v1151_v8 = vld [vmem:[#allocation3 + $0x8] sm:$0xff]  ;;  %v1152_v9 = vld [vmem:[#allocation3 + $0x10] sm:$0xff] }
 0x2ca   : > { %v1125_v55 = vadd.f32 1.0, %v2017_v50  ;;  %v1098_v56 = vmul.f32 0.70710677, %v1062_v49  ;;  %v1067_v58 = vpop.f32.mrb[15].mxu0  ;;  %v1066_v22 = vadd.f32 %v1065_v52, %v2607_v46  ;;  %v1139_v2 = vmul.f32 %v1123_v48, %v1075_v53  ;;  %v1150_v48 = vld [vmem:[#allocation3] sm:$0xff] }
 0x2cb   : > { %v1140_v1 = vmul.f32 %v1124_v63, %v1076_v62  ;;  %v1099_v12 = vmul.f32 0.70710677, %v1064_v51  ;;  %v1068_v57 = vadd.f32 %v1067_v58, %v2611_v47  ;;  %v1078_v46 = vmul.f32 0.5, %v2622_v14  ;;  %v1153_v63 = vld [vmem:[#allocation3 + $0x18] sm:$0xff]  ;;  %v1155_v58 = vld [vmem:[#allocation3 + $0x28] sm:$0xff] }
 0x2cc   : > { %v1141_v3 = vmul.f32 %v1125_v55, %v1077_v54  ;;  %2026 = verf.f32 %v1098_v56  ;;  %v1100_v11 = vmul.f32 0.70710677, %v1066_v22  ;;  %v1079_v47 = vmul.f32 0.5, %v2625_v26  ;;  %v1154_v56 = vld [vmem:[#allocation3 + $0x20] sm:$0xff] }
 0x2cd   : > { %2028 = verf.f32 %v1099_v12  ;;  %v1168_v4 = vpack.c.bf16 %v1140_v1, %v1138_v0  ;;  %v1101_v59 = vmul.f32 0.70710677, %v1068_v57  ;;  %v1082_v24 = vmul.f32 0.5, %v1062_v49  ;;  %v1156_v1 = vld [vmem:[#allocation3 + $0x30] sm:$0xff] }
 0x2ce   : > { %v2019_v5 = vpop.eup %2018  ;;  %v1169_v23 = vpack.c.bf16 %v1141_v3, %v1139_v2  ;;  %2030 = verf.f32 %v1100_v11  ;;  %v1084_v18 = vmul.f32 0.5, %v1066_v22  ;;  %v1083_v26 = vmul.f32 0.5, %v1064_v51  ;;  %v1157_v2 = vld [vmem:[#allocation3 + $0x38] sm:$0xff] }
 0x2cf   : > { %v2021_v6 = vpop.eup %2020  ;;  %v1126_v7 = vadd.f32 1.0, %v2019_v5  ;;  %2032 = verf.f32 %v1101_v59  ;;  %v1085_v34 = vmul.f32 0.5, %v1068_v57  ;;  %v1158_v59 = vld [vmem:[#allocation3 + $0x40] sm:$0xff] }
 0x2d0   : > { %v2023_v10 = vpop.eup %2022  ;;  %v1127_v13 = vadd.f32 1.0, %v2021_v6  ;;  %1408 = vmatprep.mubr.bf16.mxu1 %v1169_v23  ;;  %v1159_v23 = vld [vmem:[#allocation3 + $0x48] sm:$0xff] }
 0x2d1   : > { %v2025_v15 = vpop.eup %2024  ;;  %v1128_v17 = vadd.f32 1.0, %v2023_v10  ;;  %1409 = vmatmul.mubr.bf16.gmra.mrb[4].mxu1 %v1168_v4  ;;  %v1142_v37 = vmul.f32 %v1126_v7, %v1078_v46  ;;  %v1160_v7 = vld [vmem:[#allocation3 + $0x50] sm:$0xff] }
 0x2d2   : > { %v1129_v36 = vadd.f32 1.0, %v2025_v15  ;;  %v1143_v21 = vmul.f32 %v1127_v13, %v1079_v47  ;;  %v1161_v15 = vld [vmem:[#allocation3 + $0x58] sm:$0xff] }
 0x2d3   : > { %v1144_v20 = vmul.f32 %v1128_v17, %v1080_v16 }
 0x2d4   : > { %v1145_v27 = vmul.f32 %v1129_v36, %v1081_v25  ;;  %v1162_v36 = vld [vmem:[#allocation3 + $0x60] sm:$0xff] }
 0x2d5   : > { %v1170_v28 = vpack.c.bf16 %v1144_v20, %v1142_v37  ;;  %v1163_v37 = vld [vmem:[#allocation3 + $0x68] sm:$0xff] }
 0x2d6   : > { %v2027_v29 = vpop.eup %2026  ;;  %v1171_v30 = vpack.c.bf16 %v1145_v27, %v1143_v21  ;;  %v1164_v21 = vld [vmem:[#allocation3 + $0x70] sm:$0xff] }
 0x2d7   : > { %v2029_v32 = vpop.eup %2028  ;;  %v1130_v35 = vadd.f32 1.0, %v2027_v29  ;;  %v1165_v29 = vld [vmem:[#allocation3 + $0x78] sm:$0xff] }
 0x2d8   : > { %1418 = vmatprep.mubr.bf16.mxu1 %v1171_v30  ;;  %v2031_v39 = vpop.eup %2030  ;;  %v1131_v40 = vadd.f32 1.0, %v2029_v32 }
 0x2d9   : > { %v2033_v14 = vpop.eup %2032  ;;  %v1132_v19 = vadd.f32 1.0, %v2031_v39  ;;  %1419 = vmatmul.mubr.bf16.gmra.mrb[8].mxu1 %v1170_v28  ;;  %v1146_v33 = vmul.f32 %v1130_v35, %v1082_v24  ;;  %v1491_v24 = vld [vmem:[%s2783_s6] sm:$0x3] (!%p1783_p7) }
 0x2da   : > { %v1133_v31 = vadd.f32 1.0, %v2033_v14  ;;  %v1147_v41 = vmul.f32 %v1131_v40, %v1083_v26 }
 0x2db   : > { %v1148_v38 = vmul.f32 %v1132_v19, %v1084_v18  ;;  %v1519_v18 = vld [vmem:[%s2374_s14] sm:$0xff] (!%p1783_p7)  ;;  %v2644_v19 = vrot.slane (!%p1783_p7), %v1491_v24, %v829_v43 }
 0x2dc   : > { %v1149_v42 = vmul.f32 %v1133_v31, %v1085_v34  ;;  %v2648_v34 = vrot.slane (!%p1783_p7), %v1491_v24, %v833_v45  ;;  %v1520_v31 = vld [vmem:[%s2374_s14 + $0x8] sm:$0xff] (!%p1783_p7) }
 0x2dd   : > { %v1172_v60 = vpack.c.bf16 %v1148_v38, %v1146_v33  ;;  %v1521_v38 = vld [vmem:[%s2374_s14 + $0x10] sm:$0xff] (!%p1783_p7) }
 0x2de   : > { %v1173_v44 = vpack.c.bf16 %v1149_v42, %v1147_v41  ;;  %v1522_v42 = vld [vmem:[%s2374_s14 + $0x18] sm:$0xff] (!%p1783_p7) }
 0x2e0   : > { %1428 = vmatprep.mubr.bf16.mxu1 %v1173_v44 }
 0x2e1   : > { %1429 = vmatmul.mubr.bf16.gmra.mrb[12].mxu1 %v1172_v60 }
 0x39c   : > { %v1400_v50 = vpop.f32.mrb[0].mxu1 }
 0x39d   : > { %v1439_v62 = vadd.f32 %v1400_v50, %v1150_v48  ;;  %v1402_v49 = vpop.f32.mrb[1].mxu1 }
 0x39e   : > { %v1440_v52 = vadd.f32 %v1402_v49, %v1151_v8  ;;  %v1404_v53 = vpop.f32.mrb[2].mxu1 }
 0x39f   : > { %1455 = vst [vmem:[#allocation3] sm:$0xff] %v1439_v62  ;;  %v1441_v51 = vadd.f32 %v1404_v53, %v1152_v9  ;;  %v1406_v54 = vpop.f32.mrb[3].mxu1  ;;  %v1524_v62 = vld [vmem:[%s2374_s14 + $0x28] sm:$0xff] (!%p1783_p7) }
 0x3a0   : > { %1456 = vst [vmem:[#allocation3 + $0x8] sm:$0xff] %v1440_v52  ;;  %v1442_v55 = vadd.f32 %v1406_v54, %v1153_v63  ;;  %v1525_v63 = vld [vmem:[%s2374_s14 + $0x30] sm:$0xff] (!%p1783_p7) }
 0x3a1   : > { %1457 = vst [vmem:[#allocation3 + $0x10] sm:$0xff] %v1441_v51 }
 0x3a2   : > { %1458 = vst [vmem:[#allocation3 + $0x18] sm:$0xff] %v1442_v55 }
 0x3a4   : > { %v1410_v0 = vpop.f32.mrb[4].mxu1 }
 0x3a5   : > { %v1443_v12 = vadd.f32 %v1410_v0, %v1154_v56  ;;  %v1412_v22 = vpop.f32.mrb[5].mxu1  ;;  %v1526_v56 = vld [vmem:[%s2374_s14 + $0x38] sm:$0xff] (!%p1783_p7) }
 0x3a6   : > { %v1444_v3 = vadd.f32 %v1412_v22, %v1155_v58  ;;  %v1414_v57 = vpop.f32.mrb[6].mxu1  ;;  %v1475_v14 = vld [vmem:[#allocation3] sm:$0xff] (!%p1783_p7) }
 0x3a7   : > { %1459 = vst [vmem:[#allocation3 + $0x20] sm:$0xff] %v1443_v12  ;;  %v1445_v11 = vadd.f32 %v1414_v57, %v1156_v1  ;;  %v1416_v4 = vpop.f32.mrb[7].mxu1  ;;  %v1476_v26 = vld [vmem:[#allocation3 + $0x8] sm:$0xff] (!%p1783_p7)  ;;  %v1503_v60 = vadd.f32 (!%p1783_p7), %v2644_v19, %v1475_v14 }
 0x3a8   : > { %1460 = vst [vmem:[#allocation3 + $0x28] sm:$0xff] %v1444_v3  ;;  %v1446_v5 = vadd.f32 %v1416_v4, %v1157_v2  ;;  %v1477_v33 = vld [vmem:[#allocation3 + $0x10] sm:$0xff] (!%p1783_p7)  ;;  %v1504_v44 = vadd.f32 (!%p1783_p7), %v2648_v34, %v1476_v26  ;;  %v1527_v2 = vld [vmem:[%s2374_s14 + $0x40] sm:$0xff] (!%p1783_p7)  ;;  %v1528_v57 = vld [vmem:[%s2374_s14 + $0x48] sm:$0xff] (!%p1783_p7) }
 0x3a9   : > { %1461 = vst [vmem:[#allocation3 + $0x30] sm:$0xff] %v1445_v11  ;;  %v1478_v41 = vld [vmem:[#allocation3 + $0x18] sm:$0xff] (!%p1783_p7)  ;;  %v1505_v43 = vadd.f32 (!%p1783_p7), %v2644_v19, %v1477_v33  ;;  %v1535_v52 = vadd.f32 (!%p1783_p7), %v1519_v18, %v1503_v60 }
 0x3aa   : > { %1462 = vst [vmem:[#allocation3 + $0x38] sm:$0xff] %v1446_v5  ;;  %v1506_v48 = vadd.f32 (!%p1783_p7), %v2648_v34, %v1478_v41  ;;  %v1536_v53 = vadd.f32 (!%p1783_p7), %v1520_v31, %v1504_v44 }
 0x3ab   : > { %v1537_v51 = vadd.f32 (!%p1783_p7), %v1521_v38, %v1505_v43  ;;  %1551 = vst [vmem:[%s2387_s17] sm:$0xff] (!%p1783_p7), %v1535_v52 }
 0x3ac   : > { %v1420_v6 = vpop.f32.mrb[8].mxu1  ;;  %v1538_v54 = vadd.f32 (!%p1783_p7), %v1522_v42, %v1506_v48  ;;  %1552 = vst [vmem:[%s2387_s17 + $0x8] sm:$0xff] (!%p1783_p7), %v1536_v53 }
 0x3ad   : > { %v1447_v10 = vadd.f32 %v1420_v6, %v1158_v59  ;;  %v1422_v13 = vpop.f32.mrb[9].mxu1  ;;  %1553 = vst [vmem:[%s2387_s17 + $0x10] sm:$0xff] (!%p1783_p7), %v1537_v51  ;;  %v1529_v59 = vld [vmem:[%s2374_s14 + $0x50] sm:$0xff] (!%p1783_p7) }
 0x3ae   : > { %v1448_v46 = vadd.f32 %v1422_v13, %v1159_v23  ;;  %v1424_v16 = vpop.f32.mrb[10].mxu1  ;;  %v1479_v8 = vld [vmem:[#allocation3 + $0x20] sm:$0xff] (!%p1783_p7)  ;;  %1554 = vst [vmem:[%s2387_s17 + $0x18] sm:$0xff] (!%p1783_p7), %v1538_v54 }
 0x3af   : > { %1463 = vst [vmem:[#allocation3 + $0x40] sm:$0xff] %v1447_v10  ;;  %v1449_v17 = vadd.f32 %v1424_v16, %v1160_v7  ;;  %v1426_v47 = vpop.f32.mrb[11].mxu1  ;;  %v1480_v50 = vld [vmem:[#allocation3 + $0x28] sm:$0xff] (!%p1783_p7)  ;;  %v1507_v45 = vadd.f32 (!%p1783_p7), %v2644_v19, %v1479_v8  ;;  %v1531_v16 = vld [vmem:[%s2374_s14 + $0x60] sm:$0xff] (!%p1783_p7) }
 0x3b0   : > { %1464 = vst [vmem:[#allocation3 + $0x48] sm:$0xff] %v1448_v46  ;;  %v1450_v25 = vadd.f32 %v1426_v47, %v1161_v15  ;;  %v1508_v9 = vadd.f32 (!%p1783_p7), %v2648_v34, %v1480_v50  ;;  %v1481_v49 = vld [vmem:[#allocation3 + $0x30] sm:$0xff] (!%p1783_p7)  ;;  %v1530_v15 = vld [vmem:[%s2374_s14 + $0x58] sm:$0xff] (!%p1783_p7) }
 0x3b1   : > { %1465 = vst [vmem:[#allocation3 + $0x50] sm:$0xff] %v1449_v17  ;;  %v1482_v55 = vld [vmem:[#allocation3 + $0x38] sm:$0xff] (!%p1783_p7)  ;;  %v1539_v0 = vadd.f32 (!%p1783_p7), %v1523_v61, %v1507_v45  ;;  %v1509_v12 = vadd.f32 (!%p1783_p7), %v2644_v19, %v1481_v49 }
 0x3b2   : > { %1466 = vst [vmem:[#allocation3 + $0x58] sm:$0xff] %v1450_v25  ;;  %v1540_v1 = vadd.f32 (!%p1783_p7), %v1524_v62, %v1508_v9  ;;  %v1510_v22 = vadd.f32 (!%p1783_p7), %v2648_v34, %v1482_v55 }
 0x3b3   : > { %1555 = vst [vmem:[%s2387_s17 + $0x20] sm:$0xff] (!%p1783_p7), %v1539_v0  ;;  %v1541_v6 = vadd.f32 (!%p1783_p7), %v1525_v63, %v1509_v12 }
 0x3b4   : > { %v1430_v20 = vpop.f32.mrb[12].mxu1  ;;  %1474 = sbr.rel (%p1783_p7) target bundleno = 967 (0x3c7), region = 94  ;;  %1556 = vst [vmem:[%s2387_s17 + $0x28] sm:$0xff] (!%p1783_p7), %v1540_v1  ;;  %v1542_v7 = vadd.f32 (!%p1783_p7), %v1526_v56, %v1510_v22 }
 0x3b5   : > { %v1451_v27 = vadd.f32 %v1430_v20, %v1162_v36  ;;  %v1432_v28 = vpop.f32.mrb[13].mxu1  ;;  %1557 = vst [vmem:[%s2387_s17 + $0x30] sm:$0xff] (!%p1783_p7), %v1541_v6 }
 0x3b6   : > { %v1452_v30 = vadd.f32 %v1432_v28, %v1163_v37  ;;  %v1434_v32 = vpop.f32.mrb[14].mxu1  ;;  %v1483_v58 = vld [vmem:[#allocation3 + $0x40] sm:$0xff] (!%p1783_p7)  ;;  %v1532_v37 = vld [vmem:[%s2374_s14 + $0x68] sm:$0xff] (!%p1783_p7)  ;;  %1558 = vst [vmem:[%s2387_s17 + $0x38] sm:$0xff] (!%p1783_p7), %v1542_v7 }
 0x3b7   : > { %1467 = vst [vmem:[#allocation3 + $0x60] sm:$0xff] %v1451_v27  ;;  %v1453_v35 = vadd.f32 %v1434_v32, %v1164_v21  ;;  %v1436_v39 = vpop.f32.mrb[15].mxu1  ;;  %v1484_v3 = vld [vmem:[#allocation3 + $0x48] sm:$0xff] (!%p1783_p7)  ;;  %v1511_v11 = vadd.f32 (!%p1783_p7), %v2644_v19, %v1483_v58 }
 0x3b8   : > { %1468 = vst [vmem:[#allocation3 + $0x68] sm:$0xff] %v1452_v30  ;;  %v1454_v40 = vadd.f32 %v1436_v39, %v1165_v29  ;;  %v1512_v4 = vadd.f32 (!%p1783_p7), %v2648_v34, %v1484_v3  ;;  %v1485_v5 = vld [vmem:[#allocation3 + $0x50] sm:$0xff] (!%p1783_p7) }
 0x3b9   : > { %1469 = vst [vmem:[#allocation3 + $0x70] sm:$0xff] %v1453_v35  ;;  %v1486_v23 = vld [vmem:[#allocation3 + $0x58] sm:$0xff] (!%p1783_p7)  ;;  %v1513_v10 = vadd.f32 (!%p1783_p7), %v2644_v19, %v1485_v5  ;;  %v1543_v17 = vadd.f32 (!%p1783_p7), %v1527_v2, %v1511_v11  ;;  %v1533_v30 = vld [vmem:[%s2374_s14 + $0x70] sm:$0xff] (!%p1783_p7) }
 0x3ba   : > { %1470 = vst [vmem:[#allocation3 + $0x78] sm:$0xff] %v1454_v40  ;;  %v1514_v13 = vadd.f32 (!%p1783_p7), %v2648_v34, %v1486_v23  ;;  %v1544_v47 = vadd.f32 (!%p1783_p7), %v1528_v57, %v1512_v4  ;;  %v1534_v35 = vld [vmem:[%s2374_s14 + $0x78] sm:$0xff] (!%p1783_p7) }
 0x3bb   : > { %v1545_v21 = vadd.f32 %v1529_v59, %v1513_v10  ;;  %1559 = vst [vmem:[%s2387_s17 + $0x40] sm:$0xff] %v1543_v17 }
 0x3bc   : > { %v1546_v27 = vadd.f32 %v1530_v15, %v1514_v13  ;;  %1560 = vst [vmem:[%s2387_s17 + $0x48] sm:$0xff] %v1544_v47 }
 0x3bd   : > { %1561 = vst [vmem:[%s2387_s17 + $0x50] sm:$0xff] %v1545_v21 }
 0x3be   : > { %v1487_v46 = vld [vmem:[#allocation3 + $0x60] sm:$0xff]  ;;  %1562 = vst [vmem:[%s2387_s17 + $0x58] sm:$0xff] %v1546_v27 }
 0x3bf   : > { %v1515_v25 = vadd.f32 %v2644_v19, %v1487_v46  ;;  %v1488_v36 = vld [vmem:[#allocation3 + $0x68] sm:$0xff] }
 0x3c0   : > { %v1489_v20 = vld [vmem:[#allocation3 + $0x70] sm:$0xff]  ;;  %v1516_v28 = vadd.f32 %v2648_v34, %v1488_v36 }
 0x3c1   : > { %v1517_v29 = vadd.f32 %v2644_v19, %v1489_v20  ;;  %v1490_v32 = vld [vmem:[#allocation3 + $0x78] sm:$0xff]  ;;  %v1547_v39 = vadd.f32 %v1531_v16, %v1515_v25 }
 0x3c2   : > { %v1518_v40 = vadd.f32 %v2648_v34, %v1490_v32  ;;  %v1548_v14 = vadd.f32 %v1532_v37, %v1516_v28 }
 0x3c3   : > { %v1549_v24 = vadd.f32 %v1533_v30, %v1517_v29  ;;  %1563 = vst [vmem:[%s2387_s17 + $0x60] sm:$0xff] %v1547_v39 }
 0x3c4   : > { %v1550_v18 = vadd.f32 %v1534_v35, %v1518_v40  ;;  %1564 = vst [vmem:[%s2387_s17 + $0x68] sm:$0xff] %v1548_v14 }
 0x3c5   : > { %1565 = vst [vmem:[%s2387_s17 + $0x70] sm:$0xff] %v1549_v24 }
 0x3c6   : > { %1566 = vst [vmem:[%s2387_s17 + $0x78] sm:$0xff] %v1550_v18 }
 0x3c7 PF: > { %s2807_s29 = sand.u32 1, %s2112_s25   ;;  %1574 = sbr.rel (!%p2269_p10) target bundleno = 1002 (0x3ea), region = 98 }
 0x3c8   : > { %s2699_s23 = scalar_lea.sflag [#allocation6], %s2807_s29  ;;  %s1576_s18 = ssub.s32 (%p2269_p10), 18, %s2363_s16 }
 0x3c9   : > { %p1577_p8 = scmp.lt.s32.totalorder (%p2269_p10), %s1576_s18, 8 }
 0x3ce   : > { %s2830_s18 = smov (!%p1577_p8, %s1576_s18), 8 }
 0x3cf   : > { %s2704_s11 = sshll.u32 %s2830_s18, 8 }
 0x3d0   : > { %s1582_s15 = ssub.s32 2048, %s2704_s11 }
 0x3d1   : > { %1583 = vsyncadd %s2699_s23, %s1582_s15  ;;  %p1788_p9 = scmp.ne.s32.totalorder %s2704_s11, 0  ;;  %s1800_s20 = sshll.u32 %s2132_s30, 11 }
 0x3d2   : > { %s2713_s27 = scalar_lea.hbm %s2784_s7, %s1800_s20  ;;  %s1589_s16 = sshll.u32 %s2387_s17, 4  ;;  %s2716_s16 = int_to_ptr.vmem [resolvable:$true] %s1589_s16 }
 0x3d3   : > { %s2034_s14 = scalar_lea.vmem %s2716_s16, %s2704_s11  ;;  %s2147_s3 = smov [#allocation5]  }
 0x3d4   : > { %p2035_p10 = scmp.ne.s32.totalorder %s2716_s16, %s2034_s14  ;;  %s2038_s28 = sshll.u32 %s2147_s3, 4  ;;  %s2039_s28 = int_to_ptr.vmem [resolvable:$false] %s2038_s28 }
 0x3d5   : > { %s2040_s30 = scalar_lea.vmem %s2039_s28, 4096  ;;  %p2041_p0 = scmp.lt.s32.totalorder %s2716_s16, %s2039_s28 }
 0x3d6   : > { %p2036_p11 = pnand %p2035_p10, %p1788_p9  ;;  %p2042_p1 = scmp.lt.s32.totalorder %s2040_s30, %s2034_s14 }
 0x3d8   : > { %p2037_p13 = pneg %p2036_p11  ;;  %p2043_p2 = por %p2042_p1, %p2041_p0 }
 0x3da   : > { %p2044_p3 = pnand %p2043_p2, %p2037_p13 }
 0x3dc   : > { %2047 = shalt.err (!%p2044_p3)
}
 0x3dd   : > { %s2048_s17 = scalar_lea.hbm %s2713_s27, %s2704_s11  ;;  %s2052_s19 = scalar_lea.hbm %s2784_s7, 4608 }
 0x3de   : > { %p2049_p4 = scmp.ne.s32.totalorder %s2713_s27, %s2048_s17  ;;  %p2053_p7 = scmp.lt.u32.totalorder %s2713_s27, %s2784_s7 }
 0x3df   : > { %p2054_p8 = scmp.lt.u32.totalorder %s2052_s19, %s2048_s17  ;;  %p2056_p11 = scmp.lt.u32.totalorder %s2048_s17, %s2713_s27 }
 0x3e0   : > { %p2050_p5 = pnand %p2049_p4, %p1788_p9 }
 0x3e1   : > { %p2055_p10 = por %p2054_p8, %p2053_p7 }
 0x3e2   : > { %p2051_p6 = pneg %p2050_p5 }
 0x3e3   : > { %p2057_p13 = por %p2056_p11, %p2055_p10 }
 0x3e5   : > { %p2058_p0 = pnand %p2057_p13, %p2051_p6 }
 0x3e7   : > { %2061 = shalt.err (!%p2058_p0)
}
 0x3e8   : > { %s2148_s8 = smov 256   ;;  %s2149_s29 = smov 16  }
 0x3e9   : > { %1595 = dma.vmem_to_hbm [thread:$0]  (%p1788_p9), %s2716_s16, %s2704_s11, %s2713_s27, %s2699_s23, %s2148_s8, %s2148_s8, %s2149_s29  }
 0x3ea PF: > { %p1806_p1 = scmp.ge.s32.totalorder %s2144_s10, 2  ;;  %s1604_s15 = sand.u32 1, %s2108_s24  }
 0x3eb   : > { %s1605_s20 = scalar_lea.sflag [#allocation6], %s1604_s15 }
 0x3ec   : > { %p1803_p2 = pnand %p1806_p1, %p2276_p12 }
 0x3ee   : > { %2103 = dma.done.wait (!%p1803_p2), %s1605_s20, 2048  }
 0x3ef   : > { %2105 = vsyncadd (!%p1803_p2), %s1605_s20, 4294965248  ;;  %s20_s10 = sadd.s32 1, %s2144_s10   ;;  %s2809_s12 = sld [smem:[#allocation8_spill]] }
 0x3f0   : > { %p17_p3 = scmp.ge.s32.totalorder %s20_s10, 8   ;;  %s2810_s26 = sld [smem:[#allocation15_spill]] }
 0x3f1   : > { %s2811_s27 = sld [smem:[#allocation9_spill]]  ;;  %s2812_s28 = sld [smem:[#allocation14_spill]] }
 0x3f2   : > { %s2813_s29 = sld [smem:[#allocation10_spill]]  ;;  %s2814_s30 = sld [smem:[#allocation11_spill]] }
 0x3f3   : > { %s2815_s8 = sld [smem:[#allocation12_spill]]  ;;  %s2816_s9 = sld [smem:[#allocation13_spill]] }
 0x3f4   : > { %s2817_s24 = smov %s2112_s25  ;;  %19 = sbr.rel (!%p17_p3) target bundleno = 8 (0x8), region = 143 }
 0x3f5   : > { %s2818_s25 = smov %s2809_s12 }
 0x3fb   :  { %1610 = vsyncpa [#allocation6], 1 }
 0x3fc   :  { %1612 = vsyncpa [#allocation6 + $0x1], 1 }

</bundles_post_ra>
